<compile_context>
chip_gen: v6e
topology: v6e:2x2x1
jax: 0.10.0
libtpu: 0.0.40
codegen_flags: <defaults>
</compile_context>

<pallas_src>
import jax
import jax.numpy as jnp
import numpy as np
from jax.experimental import pallas as pl
from jax.experimental.pallas import tpu as pltpu


def _round_up(a, b):
    return (a + b - 1) // b * b


def _default_tm():
    # 128 rows on v5e (4x128 MXU, 1 vst slot), 256 on v6e / v7x (2x256 MXU).
    try:
        kind = jax.devices()[0].device_kind.lower()
    except Exception:
        return 128
    return 128 if "v5" in kind else 256


def _agcrn_kernel(adj_ref, pre_ru_ref, h_sel_ref, qv_ref, cand_x_ref,
                  bru_ref, wch_ref, out_ref, acc_ref):
    f32 = jnp.float32
    k = pl.program_id(1)

    # --- init: accumulator starts at the (broadcast) reset|update bias -------------------
    @pl.when(k == 0)
    def _():
        acc_ref[...] = jnp.broadcast_to(bru_ref[...], acc_ref.shape)

    # --- streamed adjacency reduction (the only big matmul): bf16 MXU, f32 accumulate ----
    # acc[tm, Q*2D] += adj[nodes_ind][:, k-tile] @ (combined @ [Wr|Wu])[k-tile, :]
    acc_ref[...] += jnp.dot(adj_ref[...], pre_ru_ref[...], preferred_element_type=f32)

    # --- finalize: gate math on this row tile (runs once, at the last N tile) ------------
    @pl.when(k == pl.num_programs(1) - 1)
    def _():
        TM, Q = qv_ref.shape           # static python ints
        D = h_sel_ref.shape[-1]
        D2 = 2 * D

        qv = qv_ref[...]               # [TM, Q]   f32 (elementwise/EUP stays f32: v5e-safe)
        h_sel = h_sel_ref[...]         # [TM, D]   f32
        ru_big = acc_ref[...]          # [TM, Q*2D] = adj_sel @ combined @ [Wr|Wu] + [br|bu]

        # query-weighted sums over Q — one live column broadcast per step keeps vreg
        # pressure low even for large D.
        r_pre = jnp.zeros((TM, D), f32)
        u_pre = jnp.zeros((TM, D), f32)
        for q in range(Q):
            qb = jnp.broadcast_to(qv[:, q:q + 1], (TM, D))
            r_pre = r_pre + qb * ru_big[:, q * D2:q * D2 + D]
            u_pre = u_pre + qb * ru_big[:, q * D2 + D:(q + 1) * D2]
        r = jax.nn.sigmoid(r_pre)
        u = jax.nn.sigmoid(u_pre)

        h_new = r * h_sel              # h[nodes_ind] = r * h[nodes_ind]

        # candidate gate: x-part + bias were pre-folded in the wrapper; only the
        # r-dependent h-part matmul must stay in-kernel.
        cand_big = cand_x_ref[...] + jnp.dot(h_new.astype(wch_ref.dtype), wch_ref[...],
                                             preferred_element_type=f32)   # [TM, Q*D]
        c_pre = jnp.zeros((TM, D), f32)
        for q in range(Q):
            qb = jnp.broadcast_to(qv[:, q:q + 1], (TM, D))
            c_pre = c_pre + qb * cand_big[:, q * D:(q + 1) * D]
        cand = jnp.tanh(c_pre)

        # TODO(synk): if D stays tiny and profiling shows the store/VPU slot binding at
        # large M, re-layout to a lane-dense [D, tm] output instead of masked [tm, D] stores.
        out_ref[...] = (1.0 - u) * h_new + u * cand


def agcrn_cell_with_linear(x, h, query_vectors, adj, nodes_ind, params, *, tm=None, tn=None):
    """Pallas-backed forward. Returns [M, D] where M = len(nodes_ind)."""
    N = x.shape[0]
    M, Q = query_vectors.shape
    D = h.shape[-1]
    IN = 2 * D + 1
    (Wr, br), (Wu, bu), (Wc, bc) = params["reset"], params["update"], params["candidate"]

    f32, bf16 = jnp.float32, jnp.bfloat16

    # --- tile sizes (padded grids; no tm=M fallback) -------------------------------------
    if tm is None:
        tm = _default_tm()                               # 128 (v5e) / 256 (v6e, v7x)
    tm = _round_up(max(8, min(tm, _round_up(M, 128))), 8)
    if tn is None:
        tn = min(_round_up(N, 128), 512)                 # lane-aligned N tile, modest padding
    else:
        tn = _round_up(tn, 128)
    m_pad = _round_up(M, tm)
    n_pad = _round_up(N, tn)

    # --- wrapper-side pre-folds (everything not dependent on r is hoisted) ---------------
    # fused reset|update weights flattened over (q, out): Wru_flat[i, q*2D+o] = [Wr|Wu][q,i,o]
    Wru_flat = jnp.transpose(jnp.concatenate([Wr, Wu], axis=-1), (1, 0, 2)).reshape(IN, Q * 2 * D)
    bru_flat = jnp.concatenate([br, bu], axis=-1).reshape(1, Q * 2 * D).astype(f32)
    # candidate weights split at the x/h feature boundary (rows [0, D+1) vs [D+1, 2D+1))
    Wc_x_flat = jnp.transpose(Wc[:, :D + 1, :], (1, 0, 2)).reshape(D + 1, Q * D)
    Wc_h_flat = jnp.transpose(Wc[:, D + 1:, :], (1, 0, 2)).reshape(D, Q * D).astype(bf16)
    bc_flat = bc.reshape(1, Q * D).astype(f32)

    combined = jnp.concatenate([x, h], axis=-1).astype(f32)                   # [N, 2D+1]
    # reassociated gate chain:  adj_sel @ (combined @ Wru)  ==  (adj_sel @ combined) @ Wru
    pre_ru = (combined @ Wru_flat.astype(f32)).astype(bf16)                   # [N, Q*2D]
    x_sel = x[nodes_ind].astype(f32)                                          # [M, D+1]
    cand_x_pre = (x_sel @ Wc_x_flat.astype(f32) + bc_flat).astype(f32)        # [M, Q*D]
    adj_sel = adj[nodes_ind].astype(bf16)                                     # [M, N] bf16
    # TODO(synk): for very large M*N, avoid materializing adj_sel in HBM — keep adj in
    # pl.ANY, scalar-prefetch nodes_ind (PrefetchScalarGridSpec) and row-gather tiles with
    # make_async_copy into a double-buffered VMEM scratch.
    h_sel = h[nodes_ind].astype(f32)                                          # [M, D]
    qv = query_vectors.astype(f32)                                            # [M, Q]

    # pad the selected-row axis (M) and the reduction axis (N) up to tile multiples
    adj_sel = jnp.pad(adj_sel, ((0, m_pad - M), (0, n_pad - N)))
    pre_ru = jnp.pad(pre_ru, ((0, n_pad - N), (0, 0)))
    h_sel = jnp.pad(h_sel, ((0, m_pad - M), (0, 0)))
    qv = jnp.pad(qv, ((0, m_pad - M), (0, 0)))
    cand_x_pre = jnp.pad(cand_x_pre, ((0, m_pad - M), (0, 0)))

    grid = (m_pad // tm, n_pad // tn)   # row tiles (parallel) x N reduction (arbitrary, last)

    out = pl.pallas_call(
        _agcrn_kernel,
        out_shape=jax.ShapeDtypeStruct((m_pad, D), f32),
        grid=grid,
        in_specs=[
            pl.BlockSpec((tm, tn), lambda i, k: (i, k)),         # adj[nodes_ind] tile (streamed, bf16)
            pl.BlockSpec((tn, Q * 2 * D), lambda i, k: (k, 0)),  # combined @ [Wr|Wu] tile (bf16)
            pl.BlockSpec((tm, D), lambda i, k: (i, 0)),          # h[nodes_ind]
            pl.BlockSpec((tm, Q), lambda i, k: (i, 0)),          # query vectors
            pl.BlockSpec((tm, Q * D), lambda i, k: (i, 0)),      # x_sel @ Wc_x + bc (pre-folded)
            pl.BlockSpec((1, Q * 2 * D), lambda i, k: (0, 0)),   # [br|bu]
            pl.BlockSpec((D, Q * D), lambda i, k: (0, 0)),       # Wc (h rows), bf16
        ],
        out_specs=pl.BlockSpec((tm, D), lambda i, k: (i, 0)),
        scratch_shapes=[pltpu.VMEM((tm, Q * 2 * D), jnp.float32)],   # f32 gate accumulator
        compiler_params=pltpu.CompilerParams(
            dimension_semantics=("parallel", "arbitrary"),
            vmem_limit_bytes=48 * 1024 * 1024),   # fits v7x's 64 MiB/TC with double-buffering
    )(adj_sel, pre_ru, h_sel, qv, cand_x_pre, bru_flat, Wc_h_flat)
    return out[:M]


def reference_forward(x, h, query_vectors, adj, nodes_ind, params):
    """Pure-JAX reference mirroring the PyTorch module exactly (f32 end-to-end)."""
    (Wr, br), (Wu, bu), (Wc, bc) = params["reset"], params["update"], params["candidate"]

    def lin(c, W, b):
        Wm = jnp.einsum('nd,dio->nio', query_vectors, W)
        bm = jnp.einsum('nd,do->no', query_vectors, b)
        return jnp.einsum('ni,nio->no', c, Wm) + bm

    combined = jnp.concatenate([x, h], axis=-1)
    combined = adj @ combined
    c_sel = combined[nodes_ind]
    r = jax.nn.sigmoid(lin(c_sel, Wr, br))
    u = jax.nn.sigmoid(lin(c_sel, Wu, bu))
    h_sel = r * h[nodes_ind]                       # h[nodes_ind] = r * h[nodes_ind]
    c_new = jnp.concatenate([x[nodes_ind], h_sel], axis=-1)
    cand = jnp.tanh(lin(c_new, Wc, bc))
    return (1 - u) * h_sel + u * cand


def xavier_uniform(key, shape):
    # matches nn.init.xavier_uniform_ bound
    if len(shape) == 2:
        fan_in, fan_out = shape[0], shape[1]
    else:
        rf = int(np.prod(shape[2:]))
        fan_in, fan_out = shape[1] * rf, shape[0] * rf
    bound = float(np.sqrt(6.0 / (fan_in + fan_out)))
    return jax.random.uniform(key, shape, jnp.float32, -bound, bound)


if __name__ == "__main__":
    # small shapes: input_size D = 8, query_vector_dim Q = 4, N = 32 nodes, M = 16 selected
    D, Q, N, M = 8, 4, 32, 16
    IN = 2 * D + 1  # Linear_Param input size

    key = jax.random.PRNGKey(0)
    keys = jax.random.split(key, 12)

    x = jax.random.normal(keys[0], (N, D + 1), jnp.float32)
    h = jax.random.normal(keys[1], (N, D), jnp.float32)
    query_vectors = jax.random.normal(keys[2], (M, Q), jnp.float32)
    adj_raw = jax.random.uniform(keys[3], (N, N), jnp.float32)
    adj = adj_raw / jnp.sum(adj_raw, axis=-1, keepdims=True)  # row-normalized adjacency
    nodes_ind = jnp.array([0, 2, 3, 5, 7, 9, 12, 15, 16, 18, 20, 21, 24, 27, 29, 31],
                          dtype=jnp.int32)

    params = {
        "reset":     (xavier_uniform(keys[4], (Q, IN, D)), xavier_uniform(keys[5], (Q, D))),
        "update":    (xavier_uniform(keys[6], (Q, IN, D)), xavier_uniform(keys[7], (Q, D))),
        "candidate": (xavier_uniform(keys[8], (Q, IN, D)), xavier_uniform(keys[9], (Q, D))),
    }

    out = agcrn_cell_with_linear(x, h, query_vectors, adj, nodes_ind, params)
    out = jax.block_until_ready(out)

    ref = jax.block_until_ready(
        reference_forward(x, h, query_vectors, adj, nodes_ind, params))

    # bf16 MXU operands (f32 accumulation) => compare at 1e-2 tolerance vs the f32 reference.
    np.testing.assert_allclose(np.asarray(out), np.asarray(ref), rtol=1e-2, atol=1e-2)
    print("KERNEL_OK")
</pallas_src>

<mosaic_0001>
module attributes {stable_mosaic.version = 11 : i64} {
  func.func @_agcrn_kernel(%arg0: i32, %arg1: i32, %arg2: memref<128x128xbf16, #tpu.memory_space<vmem>>, %arg3: memref<128x64xbf16, #tpu.memory_space<vmem>>, %arg4: memref<128x8xf32, #tpu.memory_space<vmem>>, %arg5: memref<128x4xf32, #tpu.memory_space<vmem>>, %arg6: memref<128x32xf32, #tpu.memory_space<vmem>>, %arg7: memref<1x64xf32, #tpu.memory_space<vmem>>, %arg8: memref<8x32xbf16, #tpu.memory_space<vmem>>, %arg9: memref<128x8xf32, #tpu.memory_space<vmem>>, %arg10: memref<128x64xf32, #tpu.memory_space<vmem>>) attributes {dimension_semantics = [#tpu.dimension_semantics<parallel>, #tpu.dimension_semantics<arbitrary>], iteration_bounds = array<i64: 1, 1>, scalar_prefetch = 0 : i64, scratch_operands = 1 : i64, tpu.core_type = #tpu.core_type<tc>, window_params = [{transform_indices = @transform_0, window_bounds = array<i64: 128, 128>}, {transform_indices = @transform_1, window_bounds = array<i64: 128, 64>}, {transform_indices = @transform_2, window_bounds = array<i64: 128, 8>}, {transform_indices = @transform_3, window_bounds = array<i64: 128, 4>}, {transform_indices = @transform_4, window_bounds = array<i64: 128, 32>}, {pipeline_mode = #tpu.pipeline_mode<synchronous>, transform_indices = @transform_5, window_bounds = array<i64: 1, 64>}, {pipeline_mode = #tpu.pipeline_mode<synchronous>, transform_indices = @transform_6, window_bounds = array<i64: 8, 32>}, {transform_indices = @transform_7, window_bounds = array<i64: 128, 8>}]} {
    %c0_i32 = arith.constant 0 : i32
    %0 = arith.cmpi eq, %arg1, %c0_i32 : i32
    %1 = arith.extui %0 : i1 to i32
    %c0_i32_0 = arith.constant 0 : i32
    %2 = arith.cmpi ne, %1, %c0_i32_0 : i32
    scf.if %2 {
      %c0_10 = arith.constant 0 : index
      %c0_11 = arith.constant 0 : index
      %12 = vector.load %arg7[%c0_10, %c0_11] : memref<1x64xf32, #tpu.memory_space<vmem>>, vector<1x64xf32>
      %13 = vector.shape_cast %12 : vector<1x64xf32> to vector<1x64xf32>
      %14 = vector.broadcast %13 : vector<1x64xf32> to vector<128x64xf32>
      %c0_12 = arith.constant 0 : index
      %c0_13 = arith.constant 0 : index
      %15 = vector.load %arg10[%c0_12, %c0_13] : memref<128x64xf32, #tpu.memory_space<vmem>>, vector<128x64xf32>
      tpu.vector_store %arg10[%c0_12, %c0_13], %14 {strides = array<i32>} : memref<128x64xf32, #tpu.memory_space<vmem>>, vector<128x64xf32>,
    } else {
    }
    %c0 = arith.constant 0 : index
    %c0_1 = arith.constant 0 : index
    %3 = vector.load %arg10[%c0, %c0_1] : memref<128x64xf32, #tpu.memory_space<vmem>>, vector<128x64xf32>
    %c0_2 = arith.constant 0 : index
    %c0_3 = arith.constant 0 : index
    %4 = vector.load %arg2[%c0_2, %c0_3] : memref<128x128xbf16, #tpu.memory_space<vmem>>, vector<128x128xbf16>
    %c0_4 = arith.constant 0 : index
    %c0_5 = arith.constant 0 : index
    %5 = vector.load %arg3[%c0_4, %c0_5] : memref<128x64xbf16, #tpu.memory_space<vmem>>, vector<128x64xbf16>
    %cst = arith.constant dense<0.000000e+00> : vector<128x64xf32>
    %6 = tpu.matmul %4, %5, %cst {dimension_numbers = #tpu.dot_dimension_numbers<[1], [0], [0], [1], [0, 0, 1, 1], [], []>} : vector<128x128xbf16>, vector<128x64xbf16>, vector<128x64xf32> -> vector<128x64xf32>
    %7 = arith.addf %3, %6 : vector<128x64xf32>
    %c0_6 = arith.constant 0 : index
    %c0_7 = arith.constant 0 : index
    %8 = vector.load %arg10[%c0_6, %c0_7] : memref<128x64xf32, #tpu.memory_space<vmem>>, vector<128x64xf32>
    tpu.vector_store %arg10[%c0_6, %c0_7], %7 {strides = array<i32>} : memref<128x64xf32, #tpu.memory_space<vmem>>, vector<128x64xf32>,
    %c0_i32_8 = arith.constant 0 : i32
    %9 = arith.cmpi eq, %arg1, %c0_i32_8 : i32
    %10 = arith.extui %9 : i1 to i32
    %c0_i32_9 = arith.constant 0 : i32
    %11 = arith.cmpi ne, %10, %c0_i32_9 : i32
    scf.if %11 {
      %c0_10 = arith.constant 0 : index
      %c0_11 = arith.constant 0 : index
      %12 = vector.load %arg5[%c0_10, %c0_11] : memref<128x4xf32, #tpu.memory_space<vmem>>, vector<128x4xf32>
      %c0_12 = arith.constant 0 : index
      %c0_13 = arith.constant 0 : index
      %13 = vector.load %arg4[%c0_12, %c0_13] : memref<128x8xf32, #tpu.memory_space<vmem>>, vector<128x8xf32>
      %c0_14 = arith.constant 0 : index
      %c0_15 = arith.constant 0 : index
      %14 = vector.load %arg10[%c0_14, %c0_15] : memref<128x64xf32, #tpu.memory_space<vmem>>, vector<128x64xf32>
      %cst_16 = arith.constant 0.000000e+00 : f32
      %15 = vector.broadcast %cst_16 : f32 to vector<128x8xf32>
      %cst_17 = arith.constant 0.000000e+00 : f32
      %16 = vector.broadcast %cst_17 : f32 to vector<128x8xf32>
      %17 = vector.extract_strided_slice %12 {offsets = [0, 0], sizes = [128, 1], strides = [1, 1]} : vector<128x4xf32> to vector<128x1xf32>
      %18 = vector.shape_cast %17 : vector<128x1xf32> to vector<128x1xf32>
      %19 = vector.broadcast %18 : vector<128x1xf32> to vector<128x8xf32>
      %20 = vector.extract_strided_slice %14 {offsets = [0, 0], sizes = [128, 8], strides = [1, 1]} : vector<128x64xf32> to vector<128x8xf32>
      %21 = arith.mulf %19, %20 : vector<128x8xf32>
      %22 = arith.addf %15, %21 : vector<128x8xf32>
      %23 = vector.extract_strided_slice %14 {offsets = [0, 8], sizes = [128, 8], strides = [1, 1]} : vector<128x64xf32> to vector<128x8xf32>
      %24 = arith.mulf %19, %23 : vector<128x8xf32>
      %25 = arith.addf %16, %24 : vector<128x8xf32>
      %26 = vector.extract_strided_slice %12 {offsets = [0, 1], sizes = [128, 1], strides = [1, 1]} : vector<128x4xf32> to vector<128x1xf32>
      %27 = vector.shape_cast %26 : vector<128x1xf32> to vector<128x1xf32>
      %28 = vector.broadcast %27 : vector<128x1xf32> to vector<128x8xf32>
      %29 = vector.extract_strided_slice %14 {offsets = [0, 16], sizes = [128, 8], strides = [1, 1]} : vector<128x64xf32> to vector<128x8xf32>
      %30 = arith.mulf %28, %29 : vector<128x8xf32>
      %31 = arith.addf %22, %30 : vector<128x8xf32>
      %32 = vector.extract_strided_slice %14 {offsets = [0, 24], sizes = [128, 8], strides = [1, 1]} : vector<128x64xf32> to vector<128x8xf32>
      %33 = arith.mulf %28, %32 : vector<128x8xf32>
      %34 = arith.addf %25, %33 : vector<128x8xf32>
      %35 = vector.extract_strided_slice %12 {offsets = [0, 2], sizes = [128, 1], strides = [1, 1]} : vector<128x4xf32> to vector<128x1xf32>
      %36 = vector.shape_cast %35 : vector<128x1xf32> to vector<128x1xf32>
      %37 = vector.broadcast %36 : vector<128x1xf32> to vector<128x8xf32>
      %38 = vector.extract_strided_slice %14 {offsets = [0, 32], sizes = [128, 8], strides = [1, 1]} : vector<128x64xf32> to vector<128x8xf32>
      %39 = arith.mulf %37, %38 : vector<128x8xf32>
      %40 = arith.addf %31, %39 : vector<128x8xf32>
      %41 = vector.extract_strided_slice %14 {offsets = [0, 40], sizes = [128, 8], strides = [1, 1]} : vector<128x64xf32> to vector<128x8xf32>
      %42 = arith.mulf %37, %41 : vector<128x8xf32>
      %43 = arith.addf %34, %42 : vector<128x8xf32>
      %44 = vector.extract_strided_slice %12 {offsets = [0, 3], sizes = [128, 1], strides = [1, 1]} : vector<128x4xf32> to vector<128x1xf32>
      %45 = vector.shape_cast %44 : vector<128x1xf32> to vector<128x1xf32>
      %46 = vector.broadcast %45 : vector<128x1xf32> to vector<128x8xf32>
      %47 = vector.extract_strided_slice %14 {offsets = [0, 48], sizes = [128, 8], strides = [1, 1]} : vector<128x64xf32> to vector<128x8xf32>
      %48 = arith.mulf %46, %47 : vector<128x8xf32>
      %49 = arith.addf %40, %48 : vector<128x8xf32>
      %50 = vector.extract_strided_slice %14 {offsets = [0, 56], sizes = [128, 8], strides = [1, 1]} : vector<128x64xf32> to vector<128x8xf32>
      %51 = arith.mulf %46, %50 : vector<128x8xf32>
      %52 = arith.addf %43, %51 : vector<128x8xf32>
      %53 = arith.negf %49 : vector<128x8xf32>
      %54 = math.exp %53 : vector<128x8xf32>
      %cst_18 = arith.constant 1.000000e+00 : f32
      %55 = vector.broadcast %cst_18 : f32 to vector<128x8xf32>
      %56 = arith.addf %55, %54 : vector<128x8xf32>
      %57 = arith.divf %55, %56 : vector<128x8xf32>
      %58 = arith.negf %52 : vector<128x8xf32>
      %59 = math.exp %58 : vector<128x8xf32>
      %cst_19 = arith.constant 1.000000e+00 : f32
      %60 = vector.broadcast %cst_19 : f32 to vector<128x8xf32>
      %61 = arith.addf %60, %59 : vector<128x8xf32>
      %62 = arith.divf %60, %61 : vector<128x8xf32>
      %63 = arith.mulf %57, %13 : vector<128x8xf32>
      %c0_20 = arith.constant 0 : index
      %c0_21 = arith.constant 0 : index
      %64 = vector.load %arg6[%c0_20, %c0_21] : memref<128x32xf32, #tpu.memory_space<vmem>>, vector<128x32xf32>
      %65 = arith.truncf %63 : vector<128x8xf32> to vector<128x8xbf16>
      %c0_22 = arith.constant 0 : index
      %c0_23 = arith.constant 0 : index
      %66 = vector.load %arg8[%c0_22, %c0_23] : memref<8x32xbf16, #tpu.memory_space<vmem>>, vector<8x32xbf16>
      %cst_24 = arith.constant dense<0.000000e+00> : vector<128x32xf32>
      %67 = tpu.matmul %65, %66, %cst_24 {dimension_numbers = #tpu.dot_dimension_numbers<[1], [0], [0], [1], [0, 0, 1, 1], [], []>} : vector<128x8xbf16>, vector<8x32xbf16>, vector<128x32xf32> -> vector<128x32xf32>
      %68 = arith.addf %64, %67 : vector<128x32xf32>
      %cst_25 = arith.constant 0.000000e+00 : f32
      %69 = vector.broadcast %cst_25 : f32 to vector<128x8xf32>
      %70 = vector.extract_strided_slice %12 {offsets = [0, 0], sizes = [128, 1], strides = [1, 1]} : vector<128x4xf32> to vector<128x1xf32>
      %71 = vector.shape_cast %70 : vector<128x1xf32> to vector<128x1xf32>
      %72 = vector.broadcast %71 : vector<128x1xf32> to vector<128x8xf32>
      %73 = vector.extract_strided_slice %68 {offsets = [0, 0], sizes = [128, 8], strides = [1, 1]} : vector<128x32xf32> to vector<128x8xf32>
      %74 = arith.mulf %72, %73 : vector<128x8xf32>
      %75 = arith.addf %69, %74 : vector<128x8xf32>
      %76 = vector.extract_strided_slice %12 {offsets = [0, 1], sizes = [128, 1], strides = [1, 1]} : vector<128x4xf32> to vector<128x1xf32>
      %77 = vector.shape_cast %76 : vector<128x1xf32> to vector<128x1xf32>
      %78 = vector.broadcast %77 : vector<128x1xf32> to vector<128x8xf32>
      %79 = vector.extract_strided_slice %68 {offsets = [0, 8], sizes = [128, 8], strides = [1, 1]} : vector<128x32xf32> to vector<128x8xf32>
      %80 = arith.mulf %78, %79 : vector<128x8xf32>
      %81 = arith.addf %75, %80 : vector<128x8xf32>
      %82 = vector.extract_strided_slice %12 {offsets = [0, 2], sizes = [128, 1], strides = [1, 1]} : vector<128x4xf32> to vector<128x1xf32>
      %83 = vector.shape_cast %82 : vector<128x1xf32> to vector<128x1xf32>
      %84 = vector.broadcast %83 : vector<128x1xf32> to vector<128x8xf32>
      %85 = vector.extract_strided_slice %68 {offsets = [0, 16], sizes = [128, 8], strides = [1, 1]} : vector<128x32xf32> to vector<128x8xf32>
      %86 = arith.mulf %84, %85 : vector<128x8xf32>
      %87 = arith.addf %81, %86 : vector<128x8xf32>
      %88 = vector.extract_strided_slice %12 {offsets = [0, 3], sizes = [128, 1], strides = [1, 1]} : vector<128x4xf32> to vector<128x1xf32>
      %89 = vector.shape_cast %88 : vector<128x1xf32> to vector<128x1xf32>
      %90 = vector.broadcast %89 : vector<128x1xf32> to vector<128x8xf32>
      %91 = vector.extract_strided_slice %68 {offsets = [0, 24], sizes = [128, 8], strides = [1, 1]} : vector<128x32xf32> to vector<128x8xf32>
      %92 = arith.mulf %90, %91 : vector<128x8xf32>
      %93 = arith.addf %87, %92 : vector<128x8xf32>
      %94 = math.tanh %93 : vector<128x8xf32>
      %cst_26 = arith.constant 1.000000e+00 : f32
      %95 = vector.broadcast %cst_26 : f32 to vector<128x8xf32>
      %96 = arith.subf %95, %62 : vector<128x8xf32>
      %97 = arith.mulf %96, %63 : vector<128x8xf32>
      %98 = arith.mulf %62, %94 : vector<128x8xf32>
      %99 = arith.addf %97, %98 : vector<128x8xf32>
      %c0_27 = arith.constant 0 : index
      %c0_28 = arith.constant 0 : index
      %100 = vector.load %arg9[%c0_27, %c0_28] : memref<128x8xf32, #tpu.memory_space<vmem>>, vector<128x8xf32>
      tpu.vector_store %arg9[%c0_27, %c0_28], %99 {strides = array<i32>} : memref<128x8xf32, #tpu.memory_space<vmem>>, vector<128x8xf32>,
    } else {
    }
    return
  }
  func.func @transform_0(%arg0: i32, %arg1: i32) -> (i32, i32) {
    %c0_i32 = arith.constant 0 : i32
    return %arg0, %arg1 : i32, i32
  }
  func.func @transform_1(%arg0: i32, %arg1: i32) -> (i32, i32) {
    %c0_i32 = arith.constant 0 : i32
    %c0_i32_0 = arith.constant 0 : i32
    return %arg1, %c0_i32 : i32, i32
  }
  func.func @transform_2(%arg0: i32, %arg1: i32) -> (i32, i32) {
    %c0_i32 = arith.constant 0 : i32
    %c0_i32_0 = arith.constant 0 : i32
    return %arg0, %c0_i32 : i32, i32
  }
  func.func @transform_3(%arg0: i32, %arg1: i32) -> (i32, i32) {
    %c0_i32 = arith.constant 0 : i32
    %c0_i32_0 = arith.constant 0 : i32
    return %arg0, %c0_i32 : i32, i32
  }
  func.func @transform_4(%arg0: i32, %arg1: i32) -> (i32, i32) {
    %c0_i32 = arith.constant 0 : i32
    %c0_i32_0 = arith.constant 0 : i32
    return %arg0, %c0_i32 : i32, i32
  }
  func.func @transform_5(%arg0: i32, %arg1: i32) -> (i32, i32) {
    %c0_i32 = arith.constant 0 : i32
    %c0_i32_0 = arith.constant 0 : i32
    %c0_i32_1 = arith.constant 0 : i32
    return %c0_i32, %c0_i32_0 : i32, i32
  }
  func.func @transform_6(%arg0: i32, %arg1: i32) -> (i32, i32) {
    %c0_i32 = arith.constant 0 : i32
    %c0_i32_0 = arith.constant 0 : i32
    %c0_i32_1 = arith.constant 0 : i32
    return %c0_i32, %c0_i32_0 : i32, i32
  }
  func.func @transform_7(%arg0: i32, %arg1: i32) -> (i32, i32) {
    %c0_i32 = arith.constant 0 : i32
    %c0_i32_0 = arith.constant 0 : i32
    return %arg0, %c0_i32 : i32, i32
  }
}

</mosaic_0001>

<bundles_post_ra>
// kernel: tpu_custom_call.1
= control target key start
LH: loop header
LB: loop body
LE: loop exit
PB: predicated region body
PF: predicated region fallthrough
CT: control target
= control target key end

     0   :  { %v2120_v0 = vmov 1   ;;  %v2121_v8 = vmov 2   ;;  %v2122_v15 = vmov 3   ;;  %v2123_v34 = vmov 0   ;;  %s2125_s17 = smov 96   ;;  %s2126_s18 = smov 80   ;;  %s3320_s3 = inlined_call_operand.vmem [shape: f32[128,4], index: 3, kind: input, shape index: {}]   ;;  %s3321_s1 = inlined_call_operand.vmem [shape: bf16[128,64], index: 1, kind: input, shape index: {}]   ;;  %s3322_s0 = inlined_call_operand.vmem [shape: bf16[128,128], index: 0, kind: input, shape index: {}]   ;;  %s3323_s5 = inlined_call_operand.vmem [shape: f32[1,64], index: 5, kind: input, shape index: {}]   ;;  %s3324_s6 = inlined_call_operand.vmem [shape: bf16[8,32], index: 6, kind: input, shape index: {}]   ;;  %s3325_s2 = inlined_call_operand.vmem [shape: f32[128,8], index: 2, kind: input, shape index: {}]   ;;  %s3326_s4 = inlined_call_operand.vmem [shape: f32[128,32], index: 4, kind: input, shape index: {}]   ;;  %s3327_s7 = inlined_call_operand.vmem [shape: f32[128,8], index: 7, kind: output, shape index: {}]  }
   0x1   :  { %1991 = vset.pattern.permute.xlu1 %v2120_v0  ;;  %v2174_v1 = vld [vmem:[%s3320_s3 + $0x10] sm:$0xff]  ;;  %1990 = vset.pattern.permute.xlu0 %v2120_v0  ;;  %v2008_v2 = vld [vmem:[%s3321_s1 + $0x38] sm:$0xff]   ;;  %v2010_v5 = vld [vmem:[%s3321_s1 + $0x28] sm:$0xff]   ;;  %vm38_vm0 = vcmask 523264   ;;  %vm1134_vm1 = vcmask 1043456   ;;  %vm1109_vm2 = vcmask 64512  }
   0x2   :  { %501 = vperm.xlu1 %1991, %v2174_v1   ;;  %v2184_v3 = vld [vmem:[%s3320_s3 + $0x18] sm:$0xff]  ;;  %v2009_v4 = vld [vmem:[%s3321_s1 + $0x30] sm:$0xff]   ;;  %1929 = vmatprep.subr.bf16.mxu0 %v2008_v2  ;;  %v2196_v6 = vld [vmem:[%s3320_s3] sm:$0xff]  ;;  %s2127_s28 = smov 120   ;;  %s2128_s10 = smov 104  }
   0x3   :  { %1930 = vmatpush3.bf16.msra.mxu0 %v2008_v2  ;;  %493 = vperm.xlu0 %1990, %v2196_v6   ;;  %v2202_v7 = vld [vmem:[%s3320_s3 + $0x8] sm:$0xff]  ;;  %v2011_v9 = vld [vmem:[%s3321_s1 + $0x20] sm:$0xff]   ;;  %v2012_v11 = vld [vmem:[%s3321_s1 + $0x18] sm:$0xff]  }
   0x4   :  { %1931 = vmatprep.subr.bf16.mxu0 %v2009_v4  ;;  %v2016_v10 = vld [vmem:[%s3322_s0] sm:$0xff]   ;;  %v2013_v13 = vld [vmem:[%s3321_s1 + $0x10] sm:$0xff]   ;;  %v2229_v14 = vld [vmem:[%s3320_s3 + $0x38] sm:$0xff] }
   0x5   :  { %1945 = vmatprep.mubr.bf16.mxu0 %v2016_v10  ;;  %v2219_v12 = vld [vmem:[%s3320_s3 + $0x20] sm:$0xff]  ;;  %v2237_v16 = vld [vmem:[%s3320_s3 + $0x48] sm:$0xff]  ;;  %v2257_v20 = vld [vmem:[%s3320_s3 + $0x78] sm:$0xff] }
   0x6   :  { %505 = vperm.xlu1 %1991, %v2184_v3   ;;  %v2014_v17 = vld [vmem:[%s3321_s1 + $0x8] sm:$0xff]   ;;  %v2247_v18 = vld [vmem:[%s3320_s3 + $0x60] sm:$0xff]  ;;  %v2018_v23 = vld [vmem:[%s3322_s0 + $0x10] sm:$0xff]  }
   0x7   :  { %1932 = vmatpush3.bf16.msra.mxu0 %v2009_v4  ;;  %497 = vperm.xlu0 %1990, %v2202_v7   ;;  %v2015_v19 = vld [vmem:[%s3321_s1] sm:$0xff]   ;;  %v2262_v21 = vld [vmem:[%s3320_s3 + $0x28] sm:$0xff]  ;;  %v2276_v24 = vld [vmem:[%s3320_s3 + $0x30] sm:$0xff] }
   0x8   :  { %1933 = vmatprep.subr.bf16.mxu0 %v2010_v5  ;;  %v2017_v22 = vld [vmem:[%s3322_s0 + $0x8] sm:$0xff]   ;;  %v2019_v25 = vld [vmem:[%s3322_s0 + $0x18] sm:$0xff]   ;;  %v2020_v26 = vld [vmem:[%s3322_s0 + $0x20] sm:$0xff]  }
   0x9   :  { %v340_v27 = vld [vmem:[%s3320_s3 + $0x40] sm:$0xff]  ;;  %v2021_v28 = vld [vmem:[%s3322_s0 + $0x28] sm:$0xff]   ;;  %v2022_v29 = vld [vmem:[%s3322_s0 + $0x30] sm:$0xff]  }
   0xa   :  { %1992 = vset.pattern.permute.xlu1 %v2121_v8  ;;  %v2305_v30 = vld [vmem:[%s3320_s3 + $0x58] sm:$0xff]  ;;  %v2311_v31 = vld [vmem:[%s3320_s3 + $0x68] sm:$0xff]  ;;  %v342_v33 = vld [vmem:[%s3320_s3 + $0x50] sm:$0xff] }
   0xb   :  { %657 = vperm.xlu1 %1992, %v2202_v7   ;;  %1934 = vmatpush3.bf16.msra.mxu0 %v2010_v5  ;;  %v2023_v32 = vld [vmem:[%s3322_s0 + $0x38] sm:$0xff]   ;;  %v1863_v35 = vld [vmem:[%s3323_s5] ss:$0 sm:$0xff]  ;;  %v346_v36 = vld [vmem:[%s3320_s3 + $0x70] sm:$0xff]  ;;  %s2124_s3 = smov 112  }
   0xc   :  { %1935 = vmatprep.subr.bf16.mxu0 %v2011_v9  ;;  %509 = vperm.xlu0 %1990, %v2219_v12   ;;  %41 = vst.msk [vmem:[#allocation2 + $0x10] sm:$0xff] %vm38_vm0, %v1863_v35  ;;  %39 = vst.msk [vmem:[#allocation2] sm:$0xff] %vm38_vm0, %v1863_v35 }
   0xd   :  { %40 = vst.msk [vmem:[#allocation2 + $0x8] sm:$0xff] %vm38_vm0, %v1863_v35  ;;  %42 = vst.msk [vmem:[#allocation2 + $0x18] sm:$0xff] %vm38_vm0, %v1863_v35 }
   0xe   :  { %43 = vst.msk [vmem:[#allocation2 + $0x20] sm:$0xff] %vm38_vm0, %v1863_v35  ;;  %44 = vst.msk [vmem:[#allocation2 + $0x28] sm:$0xff] %vm38_vm0, %v1863_v35 }
   0xf   :  { %661 = vperm.xlu1 %1992, %v2174_v1   ;;  %1936 = vmatpush3.bf16.msra.mxu0 %v2011_v9  ;;  %45 = vst.msk [vmem:[#allocation2 + $0x30] sm:$0xff] %vm38_vm0, %v1863_v35  ;;  %46 = vst.msk [vmem:[#allocation2 + $0x38] sm:$0xff] %vm38_vm0, %v1863_v35 }
  0x10   :  { %1937 = vmatprep.subr.bf16.mxu0 %v2012_v11  ;;  %521 = vperm.xlu0 %1990, %v2229_v14   ;;  %47 = vst.msk [vmem:[#allocation2 + $0x40] sm:$0xff] %vm38_vm0, %v1863_v35  ;;  %48 = vst.msk [vmem:[#allocation2 + $0x48] sm:$0xff] %vm38_vm0, %v1863_v35 }
  0x11   :  { %49 = vst.msk [vmem:[#allocation2 + $0x50] sm:$0xff] %vm38_vm0, %v1863_v35  ;;  %50 = vst.msk [vmem:[#allocation2 + $0x58] sm:$0xff] %vm38_vm0, %v1863_v35 }
  0x12   :  { %51 = vst.msk [vmem:[#allocation2 + $0x60] sm:$0xff] %vm38_vm0, %v1863_v35  ;;  %52 = vst.msk [vmem:[#allocation2 + $0x68] sm:$0xff] %vm38_vm0, %v1863_v35 }
  0x13   :  { %1993 = vset.pattern.permute.xlu1 %v2122_v15  ;;  %1938 = vmatpush3.bf16.msra.mxu0 %v2012_v11  ;;  %53 = vst.msk [vmem:[#allocation2 + $0x70] sm:$0xff] %vm38_vm0, %v1863_v35  ;;  %54 = vst.msk [vmem:[#allocation2 + $0x78] sm:$0xff] %vm38_vm0, %v1863_v35  ;;  %v57_v60 = vld [vmem:[#allocation2 + $0x10] sm:$0xff]  ;;  %v55_v63 = vld [vmem:[#allocation2] sm:$0xff] }
  0x14   :  { %813 = vperm.xlu1 %1993, %v2196_v6   ;;  %1939 = vmatprep.subr.bf16.mxu0 %v2013_v13  ;;  %v58_v2 = vld [vmem:[#allocation2 + $0x18] sm:$0xff] }
  0x15   :  { %529 = vperm.xlu0 %1990, %v2237_v16  }
  0x16   :  { %v61_v10 = vld [vmem:[#allocation2 + $0x30] sm:$0xff] }
  0x17   :  { %1940 = vmatpush3.bf16.msra.mxu0 %v2013_v13  ;;  %v59_v13 = vld [vmem:[#allocation2 + $0x20] sm:$0xff] }
  0x18   :  { %821 = vperm.xlu1 %1993, %v2174_v1   ;;  %1941 = vmatprep.subr.bf16.mxu0 %v2014_v17 }
  0x19   :  { %541 = vperm.xlu0 %1990, %v2247_v18  }
  0x1b   :  { %1942 = vmatpush3.bf16.msra.mxu0 %v2014_v17  ;;  %v62_v17 = vld [vmem:[#allocation2 + $0x38] sm:$0xff] }
  0x1c   :  { %825 = vperm.xlu1 %1993, %v2184_v3   ;;  %1943 = vmatprep.subr.bf16.mxu0 %v2015_v19 }
  0x1d   :  { %553 = vperm.xlu0 %1990, %v2257_v20  }
  0x1f   :  { %1944 = vmatpush3.bf16.msra.mxu0 %v2015_v19 }
  0x20   :  { %1994 = vset.pattern.permute.xlu1 %v2120_v0 }
  0x21   :  { %513 = vperm.xlu1 %1994, %v2262_v21   ;;  %2001 = vset.pattern.permute.xlu0 %v2121_v8 }
  0x22   :  { %1946 = vmatmul.mubr.bf16.vlgmr.msra.gmra.mxu0 %v2017_v22  ;;  %653 = vperm.xlu0 %2001, %v2196_v6  }
  0x23   :  { %1949 = vmatprep.mubr.bf16.mxu0 %v2018_v23  ;;  %v60_v23 = vld [vmem:[#allocation2 + $0x28] sm:$0xff] }
  0x25   :  { %517 = vperm.xlu1 %1994, %v2276_v24  }
  0x26   :  { %665 = vperm.xlu0 %2001, %v2184_v3  }
  0x29   :  { %1995 = vset.pattern.permute.xlu1 %v2121_v8 }
  0x2a   :  { %669 = vperm.xlu1 %1995, %v2219_v12   ;;  %1950 = vmatmul.mubr.bf16.gmra.mxu0 %v2019_v25 }
  0x2b   :  { %673 = vperm.xlu0 %2001, %v2262_v21   ;;  %1953 = vmatprep.mubr.bf16.mxu0 %v2020_v26  ;;  %v65_v26 = vld [vmem:[#allocation2 + $0x50] sm:$0xff] }
  0x2e   :  { %677 = vperm.xlu1 %1995, %v2276_v24  }
  0x2f   :  { %685 = vperm.xlu0 %2001, %v340_v27  }
  0x32   :  { %681 = vperm.xlu1 %1995, %v2229_v14   ;;  %1954 = vmatmul.mubr.bf16.gmra.mxu0 %v2021_v28 }
  0x33   :  { %697 = vperm.xlu0 %2001, %v2305_v30   ;;  %1957 = vmatprep.mubr.bf16.mxu0 %v2022_v29 }
  0x36   :  { %1996 = vset.pattern.permute.xlu1 %v2122_v15 }
  0x37   :  { %833 = vperm.xlu1 %1996, %v2262_v21   ;;  %705 = vperm.xlu0 %2001, %v2311_v31  }
  0x3a   :  { %1958 = vmatmul.mubr.bf16.gmra.mxu0 %v2023_v32 }
  0x3b   :  { %837 = vperm.xlu1 %1996, %v2276_v24   ;;  %2003 = vset.pattern.permute.xlu0 %v2122_v15 }
  0x3c   :  { %817 = vperm.xlu0 %2003, %v2202_v7  }
  0x3f   :  { %1997 = vset.pattern.permute.xlu1 %v2120_v0 }
  0x40   :  { %525 = vperm.xlu1 %1997, %v340_v27   ;;  %829 = vperm.xlu0 %2003, %v2219_v12  }
  0x44   :  { %533 = vperm.xlu1 %1997, %v342_v33   ;;  %841 = vperm.xlu0 %2003, %v2229_v14  }
  0x48   :  { %537 = vperm.xlu1 %1997, %v2305_v30   ;;  %849 = vperm.xlu0 %2003, %v2237_v16  }
  0x4c   :  { %1998 = vset.pattern.permute.xlu1 %v2121_v8  ;;  %861 = vperm.xlu0 %2003, %v2247_v18  }
  0x4d   :  { %689 = vperm.xlu1 %1998, %v2237_v16  }
  0x50   :  { %873 = vperm.xlu0 %2003, %v2257_v20  }
  0x51   :  { %693 = vperm.xlu1 %1998, %v342_v33  }
  0x54   :  { %2006 = vset.pattern.permute.xlu0 %v2123_v34 }
  0x55   :  { %1999 = vset.pattern.permute.xlu1 %v2122_v15  ;;  %387 = vperm.xlu0 %2006, %v2202_v7  }
  0x56   :  { %845 = vperm.xlu1 %1999, %v340_v27  }
  0x59   :  { %402 = vperm.xlu0 %2006, %v2219_v12  }
  0x5a   :  { %853 = vperm.xlu1 %1999, %v342_v33  }
  0x5d   :  { %412 = vperm.xlu0 %2006, %v2276_v24  }
  0x5e   :  { %857 = vperm.xlu1 %1999, %v2305_v30  }
  0x61   :  { %422 = vperm.xlu0 %2006, %v340_v27  }
  0x62   :  { %2000 = vset.pattern.permute.xlu1 %v2120_v0 }
  0x63   :  { %545 = vperm.xlu1 %2000, %v2311_v31  }
  0x65   :  { %432 = vperm.xlu0 %2006, %v342_v33   ;;  %v63_v33 = vld [vmem:[#allocation2 + $0x40] sm:$0xff] }
  0x67   :  { %549 = vperm.xlu1 %2000, %v346_v36  }
  0x69   :  { %442 = vperm.xlu0 %2006, %v2247_v18  }
  0x6b   :  { %2002 = vset.pattern.permute.xlu1 %v2121_v8 }
  0x6c   :  { %701 = vperm.xlu1 %2002, %v2247_v18  }
  0x6d   :  { %452 = vperm.xlu0 %2006, %v346_v36  }
  0x70   :  { %709 = vperm.xlu1 %2002, %v346_v36  }
  0x71   :  { %2007 = vset.pattern.permute.xlu0 %v2122_v15 }
  0x74   :  { %713 = vperm.xlu1 %2002, %v2257_v20  }
  0x78   :  { %2004 = vset.pattern.permute.xlu1 %v2122_v15 }
  0x79   :  { %865 = vperm.xlu1 %2004, %v2311_v31  }
  0x7d   :  { %869 = vperm.xlu1 %2004, %v346_v36   ;;  %v2372_v37 = vpop.permute.xlu1 %501 }
  0x7e   :  { %v2395_v45 = vpop.permute.xlu0 %493 }
  0x81   :  { %2005 = vset.pattern.permute.xlu1 %v2123_v34  ;;  %v2376_v38 = vpop.permute.xlu1 %505 }
  0x82   :  { %382 = vperm.xlu1 %2005, %v2196_v6   ;;  %v2399_v47 = vpop.permute.xlu0 %497  ;;  %v56_v6 = vld [vmem:[#allocation2 + $0x8] sm:$0xff] }
  0x86   :  { %392 = vperm.xlu1 %2005, %v2174_v1   ;;  %v2379_v39 = vpop.permute.xlu1 %657 }
  0x87   :  { %v2403_v49 = vpop.permute.xlu0 %509 }
  0x88   :  { %3387 = vst [vmem:[#allocation5_spill] sm:$0xff] %v2403_v49 }
  0x8a   :  { %397 = vperm.xlu1 %2005, %v2184_v3   ;;  %v2383_v40 = vpop.permute.xlu1 %661 }
  0x8b   :  { %v2407_v51 = vpop.permute.xlu0 %521 }
  0x8c   :  { %3389 = vst [vmem:[#allocation7_spill] sm:$0xff] %v2407_v51 }
  0x8e   :  { %407 = vperm.xlu1 %2005, %v2262_v21  }
  0x8f   :  { %v2386_v41 = vpop.permute.xlu1 %813 }
  0x90   :  { %v2411_v53 = vpop.permute.xlu0 %529 }
  0x91   :  { %3391 = vst [vmem:[#allocation9_spill] sm:$0xff] %v2411_v53 }
  0x92   :  { %417 = vperm.xlu1 %2005, %v2229_v14  }
  0x93   :  { %v2389_v42 = vpop.permute.xlu1 %821 }
  0x94   :  { %v2415_v55 = vpop.permute.xlu0 %541 }
  0x95   :  { %3393 = vst [vmem:[#allocation11_spill] sm:$0xff] %v2415_v55 }
  0x96   :  { %427 = vperm.xlu1 %2005, %v2237_v16  }
  0x97   :  { %v2391_v43 = vpop.permute.xlu1 %825 }
  0x98   :  { %v2419_v57 = vpop.permute.xlu0 %553 }
  0x99   :  { %3395 = vst [vmem:[#allocation13_spill] sm:$0xff] %v2419_v57 }
  0x9a   :  { %437 = vperm.xlu1 %2005, %v2305_v30  }
  0x9c   :  { %v2393_v44 = vpop.permute.xlu1 %513 }
  0x9d   :  { %3385 = vst [vmem:[#allocation3_spill] sm:$0xff] %v2393_v44  ;;  %v2423_v59 = vpop.permute.xlu0 %653 }
  0x9e   :  { %447 = vperm.xlu1 %2005, %v2311_v31  }
  0xa0   :  { %v2397_v46 = vpop.permute.xlu1 %517 }
  0xa1   :  { %v2428_v4 = vpop.permute.xlu0 %665 }
  0xa2   :  { %457 = vperm.xlu1 %2005, %v2257_v20  }
  0xa5   :  { %v2401_v48 = vpop.permute.xlu1 %669 }
  0xa6   :  { %3386 = vst [vmem:[#allocation4_spill] sm:$0xff] %v2401_v48  ;;  %v2435_v15 = vpop.permute.xlu0 %673 }
  0xa7   :  { %3399 = vst [vmem:[#allocation17_spill] sm:$0xff] %v2435_v15 }
  0xa9   :  { %v2405_v50 = vpop.permute.xlu1 %677 }
  0xaa   :  { %3388 = vst [vmem:[#allocation6_spill] sm:$0xff] %v2405_v50  ;;  %v2453_v31 = vpop.permute.xlu0 %685 }
  0xab   :  { %3401 = vst [vmem:[#allocation19_spill] sm:$0xff] %v2453_v31 }
  0xad   :  { %v2409_v52 = vpop.permute.xlu1 %681 }
  0xae   :  { %3390 = vst [vmem:[#allocation8_spill] sm:$0xff] %v2409_v52 }
  0xb2   :  { %v2413_v54 = vpop.permute.xlu1 %833 }
  0xb3   :  { %3392 = vst [vmem:[#allocation10_spill] sm:$0xff] %v2413_v54 }
  0xb6   :  { %v2417_v56 = vpop.permute.xlu1 %837 }
  0xb7   :  { %3394 = vst [vmem:[#allocation12_spill] sm:$0xff] %v2417_v56 }
  0xbb   :  { %v2421_v58 = vpop.permute.xlu1 %525 }
  0xbc   :  { %3396 = vst [vmem:[#allocation14_spill] sm:$0xff] %v2421_v58 }
  0xbf   :  { %v2425_v61 = vpop.permute.xlu1 %533 }
  0xc0   :  { %3397 = vst [vmem:[#allocation15_spill] sm:$0xff] %v2425_v61 }
  0xc3   :  { %v2430_v7 = vpop.permute.xlu1 %537 }
  0xc4   :  { %3398 = vst [vmem:[#allocation16_spill] sm:$0xff] %v2430_v7 }
  0xc8   :  { %v2439_v19 = vpop.permute.xlu1 %689 }
  0xc9   :  { %3400 = vst [vmem:[#allocation18_spill] sm:$0xff] %v2439_v19 }
  0xcc   :  { %v2455_v34 = vpop.permute.xlu1 %693 }
  0xcd   :  { %3402 = vst [vmem:[#allocation20_spill] sm:$0xff] %v2455_v34 }
  0xe2   :  { %v1947_v62 = vpop.f32.mrf.mxu0 }
  0xe3   :  { %v298_v0 = vadd.f32 %v1947_v62, %v57_v60  ;;  %v66_v60 = vld [vmem:[#allocation2 + $0x58] sm:$0xff] }
  0xe4   :  { %v233_v1 = vpop.f32.mrf.mxu0 }
  0xe5   :  { %315 = vst.msk [vmem:[#allocation2 + $0x10] sm:$0xff] %vm38_vm0, %v298_v0  ;;  %v296_v3 = vadd.f32 %v233_v1, %v55_v63 }
  0xe6   :  { %v1948_v5 = vpop.f32.mrf.mxu0 }
  0xe7   :  { %313 = vst.msk [vmem:[#allocation2] sm:$0xff] %vm38_vm0, %v296_v3  ;;  %v299_v8 = vadd.f32 %v1948_v5, %v58_v2  ;;  %v64_v2 = vld [vmem:[#allocation2 + $0x48] sm:$0xff] }
  0xe8   :  { %v236_v9 = vpop.f32.mrf.mxu0 }
  0xe9   :  { %316 = vst.msk [vmem:[#allocation2 + $0x18] sm:$0xff] %vm38_vm0, %v299_v8  ;;  %v297_v11 = vadd.f32 %v236_v9, %v56_v6  ;;  %v2470_v6 = vpop.permute.xlu0 %697  ;;  %v69_v9 = vld [vmem:[#allocation2 + $0x70] sm:$0xff] }
  0xea   :  { %v1951_v12 = vpop.f32.mrf.mxu0  ;;  %3403 = vst [vmem:[#allocation21_spill] sm:$0xff] %v2470_v6 }
  0xeb   :  { %314 = vst.msk [vmem:[#allocation2 + $0x8] sm:$0xff] %vm38_vm0, %v297_v11  ;;  %v302_v14 = vadd.f32 %v1951_v12, %v61_v10  ;;  %v2472_v10 = vpop.permute.xlu1 %845 }
  0xec   :  { %v249_v16 = vpop.f32.mrf.mxu0  ;;  %v2437_v18 = vld [vmem:[#allocation2 + $0x10] sm:$0xff]  ;;  %3404 = vst [vmem:[#allocation22_spill] sm:$0xff] %v2472_v10 }
  0xed   :  { %319 = vst.msk [vmem:[#allocation2 + $0x30] sm:$0xff] %vm38_vm0, %v302_v14  ;;  %v300_v20 = vadd.f32 %v249_v16, %v59_v13  ;;  %v558_v21 = vmul.f32 %v2372_v37, %v2437_v18  ;;  %v718_v29 = vmul.f32 %v2383_v40, %v2437_v18  ;;  %v878_v63 = vmul.f32 %v2389_v42, %v2437_v18 }
  0xee   :  { %v1952_v22 = vpop.f32.mrf.mxu0  ;;  %v2465_v3 = vld [vmem:[#allocation2] sm:$0xff] }
  0xef   :  { %317 = vst.msk [vmem:[#allocation2 + $0x20] sm:$0xff] %vm38_vm0, %v300_v20  ;;  %v303_v24 = vadd.f32 %v1952_v22, %v62_v17  ;;  %592 = vrot.lane.b32.xlu0 %v558_v21, %s2124_s3  ;;  %v556_v12 = vmul.f32 %v2395_v45, %v2465_v3  ;;  %v67_v17 = vld [vmem:[#allocation2 + $0x60] sm:$0xff]  ;;  %v70_v22 = vld [vmem:[#allocation2 + $0x78] sm:$0xff] }
  0xf0   :  { %v252_v25 = vpop.f32.mrf.mxu0  ;;  %v2446_v27 = vld [vmem:[#allocation2 + $0x18] sm:$0xff] }
  0xf1   :  { %320 = vst.msk [vmem:[#allocation2 + $0x38] sm:$0xff] %vm38_vm0, %v303_v24  ;;  %v301_v28 = vadd.f32 %v252_v25, %v60_v23  ;;  %v559_v30 = vmul.f32 %v2376_v38, %v2446_v27  ;;  %v719_v0 = vmul.f32 %v2428_v4, %v2446_v27  ;;  %v879_v13 = vmul.f32 %v2391_v43, %v2446_v27 }
  0xf2   :  { %v1955_v32 = vpop.f32.mrf.mxu0  ;;  %v2479_v14 = vld [vmem:[#allocation2 + $0x8] sm:$0xff]  ;;  %v716_v24 = vmul.f32 %v2423_v59, %v2465_v3 }
  0xf3   :  { %318 = vst.msk [vmem:[#allocation2 + $0x28] sm:$0xff] %vm38_vm0, %v301_v28  ;;  %v306_v35 = vadd.f32 %v1955_v32, %v65_v26  ;;  %752 = vrot.lane.b32.xlu0 %v718_v29, %s2125_s17  ;;  %594 = vrot.lane.b32.xlu1 %v559_v30, %s2124_s3  ;;  %v557_v25 = vmul.f32 %v2399_v47, %v2479_v14  ;;  %v2489_v26 = vpop.permute.xlu0 %705  ;;  %v68_v29 = vld [vmem:[#allocation2 + $0x68] sm:$0xff]  ;;  %v2491_v30 = vpop.permute.xlu1 %853 }
  0xf4   :  { %v265_v36 = vpop.f32.mrf.mxu0  ;;  %3405 = vst [vmem:[#allocation23_spill] sm:$0xff] %v2489_v26  ;;  %3406 = vst [vmem:[#allocation24_spill] sm:$0xff] %v2491_v30 }
  0xf5   :  { %323 = vst.msk [vmem:[#allocation2 + $0x50] sm:$0xff] %vm38_vm0, %v306_v35  ;;  %v304_v62 = vadd.f32 %v265_v36, %v63_v33  ;;  %v876_v36 = vmul.f32 %v2386_v41, %v2465_v3 }
  0xf6   :  { %v1956_v1 = vpop.f32.mrf.mxu0 }
  0xf7   :  { %321 = vst.msk [vmem:[#allocation2 + $0x40] sm:$0xff] %vm38_vm0, %v304_v62  ;;  %v307_v5 = vadd.f32 %v1956_v1, %v66_v60  ;;  %912 = vrot.lane.b32.xlu0 %v878_v63, %s2126_s18  ;;  %754 = vrot.lane.b32.xlu1 %v719_v0, %s2125_s17  ;;  %v717_v60 = vmul.f32 %v2379_v39, %v2479_v14  ;;  %v2501_v62 = vld [vmem:[#allocation2 + $0x30] sm:$0xff]  ;;  %v2506_v63 = vpop.permute.xlu0 %817  ;;  %v2508_v0 = vpop.permute.xlu1 %857 }
  0xf8   :  { %v268_v8 = vpop.f32.mrf.mxu0  ;;  %3407 = vst [vmem:[#allocation25_spill] sm:$0xff] %v2506_v63  ;;  %3408 = vst [vmem:[#allocation26_spill] sm:$0xff] %v2508_v0  ;;  %v877_v1 = vmul.f32 %v2506_v63, %v2479_v14 }
  0xf9   :  { %324 = vst.msk [vmem:[#allocation2 + $0x58] sm:$0xff] %vm38_vm0, %v307_v5  ;;  %v305_v11 = vadd.f32 %v268_v8, %v64_v2  ;;  %v562_v2 = vmul.f32 %v2397_v46, %v2501_v62  ;;  %v2514_v5 = vld [vmem:[#allocation2 + $0x38] sm:$0xff]  ;;  %v722_v8 = vmul.f32 %v2405_v50, %v2501_v62 }
  0xfa   :  { %v1959_v16 = vpop.f32.mrf.mxu0 }
  0xfb   :  { %322 = vst.msk [vmem:[#allocation2 + $0x48] sm:$0xff] %vm38_vm0, %v305_v11  ;;  %v310_v20 = vadd.f32 %v1959_v16, %v69_v9  ;;  %588 = vrot.lane.b32.xlu0 %v556_v12, %s2124_s3  ;;  %914 = vrot.lane.b32.xlu1 %v879_v13, %s2126_s18  ;;  %v563_v9 = vmul.f32 %v2407_v51, %v2514_v5  ;;  %v2522_v11 = vpop.permute.xlu0 %829  ;;  %v2524_v12 = vpop.permute.xlu1 %545 }
  0xfc   :  { %v281_v21 = vpop.f32.mrf.mxu0  ;;  %3409 = vst [vmem:[#allocation27_spill] sm:$0xff] %v2522_v11  ;;  %3410 = vst [vmem:[#allocation28_spill] sm:$0xff] %v2524_v12  ;;  %v882_v13 = vmul.f32 %v2417_v56, %v2501_v62  ;;  %v723_v16 = vmul.f32 %v2409_v52, %v2514_v5 }
  0xfd   :  { %327 = vst.msk [vmem:[#allocation2 + $0x70] sm:$0xff] %vm38_vm0, %v310_v20  ;;  %v308_v23 = vadd.f32 %v281_v21, %v67_v17  ;;  %v2532_v17 = vld [vmem:[#allocation2 + $0x20] sm:$0xff] }
  0xfe   :  { %v1960_v28 = vpop.f32.mrf.mxu0 }
  0xff   :  { %325 = vst.msk [vmem:[#allocation2 + $0x60] sm:$0xff] %vm38_vm0, %v308_v23  ;;  %v311_v32 = vadd.f32 %v1960_v28, %v70_v22  ;;  %748 = vrot.lane.b32.xlu0 %v716_v24, %s2125_s17  ;;  %590 = vrot.lane.b32.xlu1 %v557_v25, %s2124_s3  ;;  %v2536_v20 = vpop.permute.xlu0 %841  ;;  %v2538_v21 = vpop.permute.xlu1 %549  ;;  %v560_v22 = vmul.f32 %v2403_v49, %v2532_v17  ;;  %v2544_v24 = vld [vmem:[#allocation2 + $0x28] sm:$0xff] }
 0x100   :  { %v284_v33 = vpop.f32.mrf.mxu0  ;;  %3411 = vst [vmem:[#allocation29_spill] sm:$0xff] %v2536_v20  ;;  %3412 = vst [vmem:[#allocation30_spill] sm:$0xff] %v2538_v21  ;;  %v883_v23 = vmul.f32 %v2536_v20, %v2514_v5  ;;  %v720_v25 = vmul.f32 %v2401_v48, %v2532_v17  ;;  %v561_v28 = vmul.f32 %v2393_v44, %v2544_v24 }
 0x101   :  { %328 = vst.msk [vmem:[#allocation2 + $0x78] sm:$0xff] %vm38_vm0, %v311_v32  ;;  %v309_v35 = vadd.f32 %v284_v33, %v68_v29  ;;  %v880_v32 = vmul.f32 %v2522_v11, %v2532_v17  ;;  %v721_v33 = vmul.f32 %v2435_v15, %v2544_v24 }
 0x103   :  { %326 = vst.msk [vmem:[#allocation2 + $0x68] sm:$0xff] %vm38_vm0, %v309_v35  ;;  %908 = vrot.lane.b32.xlu0 %v876_v36, %s2126_s18  ;;  %750 = vrot.lane.b32.xlu1 %v717_v60, %s2125_s17  ;;  %v2552_v29 = vpop.permute.xlu1 %701  ;;  %v2560_v35 = vld [vmem:[#allocation2 + $0x50] sm:$0xff]  ;;  %v881_v60 = vmul.f32 %v2413_v54, %v2544_v24 }
 0x104   :  { %3413 = vst [vmem:[#allocation31_spill] sm:$0xff] %v2552_v29 }
 0x107   :  { %910 = vrot.lane.b32.xlu1 %v877_v1, %s2126_s18  ;;  %600 = vrot.lane.b32.xlu0 %v562_v2, %s2124_s3  ;;  %v2564_v36 = vpop.permute.xlu1 %709  ;;  %v566_v1 = vmul.f32 %v2425_v61, %v2560_v35  ;;  %v1108_v2 = vld [vmem:[%s3324_s6] sm:$0xf] }
 0x108   :  { %3414 = vst [vmem:[#allocation32_spill] sm:$0xff] %v2564_v36  ;;  %1979 = vmatprep.subr.msk.bf16.mxu1 %vm1134_vm1, %v1108_v2 }
 0x10b   :  { %760 = vrot.lane.b32.xlu0 %v722_v8, %s2125_s17  ;;  %602 = vrot.lane.b32.xlu1 %v563_v9, %s2124_s3  ;;  %v2573_v8 = vld [vmem:[#allocation2 + $0x58] sm:$0xff]  ;;  %v1136_v9 = vsel %vm1134_vm1, %v1108_v2, 0  ;;  %v2603_v2 = vpop.permute.xlu0 %849 }
 0x10c   :  { %1962 = vmatpush3.bf16.msra.mxu1 %v1136_v9  ;;  %3417 = vst [vmem:[#allocation35_spill] sm:$0xff] %v2603_v2 }
 0x10f   :  { %920 = vrot.lane.b32.xlu0 %v882_v13, %s2126_s18  ;;  %762 = vrot.lane.b32.xlu1 %v723_v16, %s2125_s17  ;;  %v726_v13 = vmul.f32 %v2455_v34, %v2560_v35  ;;  %v567_v16 = vmul.f32 %v2430_v7, %v2573_v8 }
 0x113   :  { %596 = vrot.lane.b32.xlu0 %v560_v22, %s2124_s3  ;;  %922 = vrot.lane.b32.xlu1 %v883_v23, %s2126_s18  ;;  %v2581_v22 = vpop.permute.xlu1 %713  ;;  %v886_v23 = vmul.f32 %v2491_v30, %v2560_v35 }
 0x114   :  { %3415 = vst [vmem:[#allocation33_spill] sm:$0xff] %v2581_v22 }
 0x117   :  { %756 = vrot.lane.b32.xlu0 %v720_v25, %s2125_s17  ;;  %598 = vrot.lane.b32.xlu1 %v561_v28, %s2124_s3  ;;  %v727_v25 = vmul.f32 %v2470_v6, %v2573_v8  ;;  %v2589_v28 = vld [vmem:[#allocation2 + $0x40] sm:$0xff] }
 0x118   :  { %v724_v9 = vmul.f32 %v2453_v31, %v2589_v28  ;;  %v2639_v31 = vld [vmem:[#allocation2 + $0x60] sm:$0xff] }
 0x11b   :  { %916 = vrot.lane.b32.xlu0 %v880_v32, %s2126_s18  ;;  %758 = vrot.lane.b32.xlu1 %v721_v33, %s2125_s17  ;;  %v2593_v32 = vpop.permute.xlu1 %865  ;;  %v564_v33 = vmul.f32 %v2421_v58, %v2589_v28 }
 0x11c   :  { %3416 = vst [vmem:[#allocation34_spill] sm:$0xff] %v2593_v32 }
 0x11f   :  { %918 = vrot.lane.b32.xlu1 %v881_v60, %s2126_s18  ;;  %608 = vrot.lane.b32.xlu0 %v566_v1, %s2124_s3  ;;  %v887_v60 = vmul.f32 %v2508_v0, %v2573_v8  ;;  %v2599_v1 = vld [vmem:[#allocation2 + $0x48] sm:$0xff] }
 0x123   :  { %768 = vrot.lane.b32.xlu0 %v726_v13, %s2125_s17  ;;  %610 = vrot.lane.b32.xlu1 %v567_v16, %s2124_s3  ;;  %v565_v13 = vmul.f32 %v2411_v53, %v2599_v1  ;;  %v2609_v16 = vpop.permute.xlu1 %869 }
 0x124   :  { %3418 = vst [vmem:[#allocation36_spill] sm:$0xff] %v2609_v16 }
 0x127   :  { %928 = vrot.lane.b32.xlu0 %v886_v23, %s2126_s18  ;;  %770 = vrot.lane.b32.xlu1 %v727_v25, %s2125_s17  ;;  %v884_v23 = vmul.f32 %v2472_v10, %v2589_v28  ;;  %v725_v25 = vmul.f32 %v2439_v19, %v2599_v1  ;;  %v2623_v53 = vpop.permute.xlu1 %382  ;;  %v2629_v10 = vld [vmem:[#allocation2 + $0x78] sm:$0xff] }
 0x128   :  { %v460_v49 = vmul.f32 %v2623_v53, %v2465_v3 }
 0x12b   :  { %604 = vrot.lane.b32.xlu0 %v564_v33, %s2124_s3  ;;  %930 = vrot.lane.b32.xlu1 %v887_v60, %s2126_s18  ;;  %v2617_v33 = vld [vmem:[#allocation2 + $0x70] sm:$0xff]  ;;  %v2619_v60 = vpop.permute.xlu0 %861 }
 0x12c   :  { %3419 = vst [vmem:[#allocation37_spill] sm:$0xff] %v2619_v60 }
 0x12f   :  { %764 = vrot.lane.b32.xlu0 %v724_v9, %s2125_s17  ;;  %606 = vrot.lane.b32.xlu1 %v565_v13, %s2124_s3  ;;  %v885_v9 = vmul.f32 %v2603_v2, %v2599_v1  ;;  %v570_v13 = vmul.f32 %v2538_v21, %v2617_v33  ;;  %v2633_v19 = vpop.permute.xlu0 %873  ;;  %v2641_v2 = vpop.permute.xlu1 %392 }
 0x130   :  { %3420 = vst [vmem:[#allocation38_spill] sm:$0xff] %v2633_v19  ;;  %3421 = vst [vmem:[#allocation39_spill] sm:$0xff] %v2641_v2 }
 0x133   :  { %924 = vrot.lane.b32.xlu0 %v884_v23, %s2126_s18  ;;  %766 = vrot.lane.b32.xlu1 %v725_v25, %s2125_s17  ;;  %v730_v23 = vmul.f32 %v2564_v36, %v2617_v33  ;;  %v571_v25 = vmul.f32 %v2419_v57, %v2629_v10  ;;  %v2649_v21 = vpop.permute.xlu0 %387  ;;  %v2653_v36 = vld [vmem:[#allocation2 + $0x68] sm:$0xff]  ;;  %v2655_v57 = vpop.permute.xlu1 %397 }
 0x134   :  { %v463_v34 = vmul.f32 %v2655_v57, %v2446_v27 }
 0x137   :  { %926 = vrot.lane.b32.xlu1 %v885_v9, %s2126_s18  ;;  %616 = vrot.lane.b32.xlu0 %v570_v13, %s2124_s3  ;;  %v568_v9 = vmul.f32 %v2415_v55, %v2639_v31  ;;  %v731_v13 = vmul.f32 %v2581_v22, %v2629_v10  ;;  %v2661_v55 = vpop.permute.xlu0 %402  ;;  %v2669_v22 = vpop.permute.xlu1 %407 }
 0x13b   :  { %776 = vrot.lane.b32.xlu0 %v730_v23, %s2125_s17  ;;  %618 = vrot.lane.b32.xlu1 %v571_v25, %s2124_s3  ;;  %v728_v23 = vmul.f32 %v2552_v29, %v2639_v31  ;;  %v569_v25 = vmul.f32 %v2524_v12, %v2653_v36  ;;  %v2673_v29 = vpop.permute.xlu0 %412  ;;  %v890_v12 = vmul.f32 %v2609_v16, %v2617_v33 }
 0x13f   :  { %612 = vrot.lane.b32.xlu0 %v568_v9, %s2124_s3  ;;  %778 = vrot.lane.b32.xlu1 %v731_v13, %s2125_s17  ;;  %v888_v9 = vmul.f32 %v2619_v60, %v2639_v31  ;;  %v729_v13 = vmul.f32 %v2489_v26, %v2653_v36  ;;  %v2683_v26 = vpop.permute.xlu0 %422 }
 0x143   :  { %772 = vrot.lane.b32.xlu0 %v728_v23, %s2125_s17  ;;  %614 = vrot.lane.b32.xlu1 %v569_v25, %s2124_s3  ;;  %v889_v23 = vmul.f32 %v2593_v32, %v2653_v36  ;;  %v2681_v25 = vpop.permute.xlu1 %417  ;;  %v2690_v60 = vpop.permute.xlu0 %432 }
 0x147   :  { %932 = vrot.lane.b32.xlu0 %v888_v9, %s2126_s18  ;;  %774 = vrot.lane.b32.xlu1 %v729_v13, %s2125_s17  ;;  %v891_v9 = vmul.f32 %v2633_v19, %v2629_v10  ;;  %v2688_v13 = vpop.permute.xlu1 %427  ;;  %v2694_v32 = vpop.permute.xlu0 %442 }
 0x14b   :  { %936 = vrot.lane.b32.xlu0 %v890_v12, %s2126_s18  ;;  %934 = vrot.lane.b32.xlu1 %v889_v23, %s2126_s18  ;;  %v2692_v16 = vpop.permute.xlu1 %437  ;;  %v2698_v23 = vpop.permute.xlu0 %452 }
 0x14f   :  { %938 = vrot.lane.b32.xlu1 %v891_v9, %s2126_s18  ;;  %v2696_v12 = vpop.permute.xlu1 %447  ;;  %v462_v9 = vmul.f32 %v2641_v2, %v2437_v18  ;;  %v461_v2 = vmul.f32 %v2649_v21, %v2479_v14 }
 0x153   :  { %v2700_v0 = vpop.permute.xlu1 %457 }
 0x161   :  { %v593_v58 = vpop.permute.xlu0 %592 }
 0x162   :  { %v638_v54 = vadd.f32 %v593_v58, %v462_v9 }
 0x165   :  { %v753_v6 = vpop.permute.xlu0 %752  ;;  %v595_v30 = vpop.permute.xlu1 %594 }
 0x166   :  { %v639_v61 = vadd.f32 %v595_v30, %v463_v34  ;;  %v798_v15 = vadd.f32 %v753_v6, %v638_v54 }
 0x169   :  { %v913_v19 = vpop.permute.xlu0 %912  ;;  %v755_v7 = vpop.permute.xlu1 %754 }
 0x16a   :  { %v799_v48 = vadd.f32 %v755_v7, %v639_v61  ;;  %v958_v20 = vadd.f32 %v913_v19, %v798_v15 }
 0x16c   :  { %v1882_v18 = vmul.f32 -1.442695, %v958_v20 }
 0x16d   :  { %v589_v11 = vpop.permute.xlu0 %588  ;;  %v915_v44 = vpop.permute.xlu1 %914 }
 0x16e   :  { %v959_v52 = vadd.f32 %v915_v44, %v799_v48  ;;  %v636_v50 = vadd.f32 %v589_v11, %v460_v49  ;;  %2024 = vpow2.f32 %v1882_v18 }
 0x170   :  { %v1883_v63 = vmul.f32 -1.442695, %v959_v52  ;;  %v466_v52 = vmul.f32 %v2673_v29, %v2501_v62 }
 0x171   :  { %v749_v56 = vpop.permute.xlu0 %748  ;;  %v591_v51 = vpop.permute.xlu1 %590 }
 0x172   :  { %v796_v27 = vadd.f32 %v749_v56, %v636_v50  ;;  %v637_v54 = vadd.f32 %v591_v51, %v461_v2  ;;  %2026 = vpow2.f32 %v1883_v63  ;;  %v467_v51 = vmul.f32 %v2681_v25, %v2514_v5 }
 0x175   :  { %v909_v58 = vpop.permute.xlu0 %908  ;;  %v751_v34 = vpop.permute.xlu1 %750 }
 0x176   :  { %v956_v6 = vadd.f32 %v909_v58, %v796_v27  ;;  %v797_v7 = vadd.f32 %v751_v34, %v637_v54  ;;  %v464_v54 = vmul.f32 %v2661_v55, %v2532_v17 }
 0x178   :  { %v1880_v61 = vmul.f32 -1.442695, %v956_v6 }
 0x179   :  { %v911_v15 = vpop.permute.xlu1 %910  ;;  %v601_v19 = vpop.permute.xlu0 %600 }
 0x17a   :  { %2028 = vpow2.f32 %v1880_v61  ;;  %v957_v44 = vadd.f32 %v911_v15, %v797_v7  ;;  %v642_v14 = vadd.f32 %v601_v19, %v466_v52 }
 0x17b   :  { %v2025_v30 = vpop.eup %2024 }
 0x17c   :  { %v1881_v48 = vmul.f32 -1.442695, %v957_v44  ;;  %v1022_v34 = vadd.f32 1.0, %v2025_v30 }
 0x17d   :  { %v761_v49 = vpop.permute.xlu0 %760  ;;  %v603_v3 = vpop.permute.xlu1 %602 }
 0x17e   :  { %2030 = vpow2.f32 %v1881_v48  ;;  %v802_v63 = vadd.f32 %v761_v49, %v642_v14  ;;  %v643_v11 = vadd.f32 %v603_v3, %v467_v51  ;;  %v465_v48 = vmul.f32 %v2669_v22, %v2544_v24 }
 0x17f   :  { %v2027_v20 = vpop.eup %2026  ;;  %2032 = vrcp.f32 %v1022_v34 }
 0x180   :  { %v1023_v62 = vadd.f32 1.0, %v2027_v20 }
 0x181   :  { %v921_v50 = vpop.permute.xlu0 %920  ;;  %v763_v56 = vpop.permute.xlu1 %762 }
 0x182   :  { %v962_v18 = vadd.f32 %v921_v50, %v802_v63  ;;  %v803_v27 = vadd.f32 %v763_v56, %v643_v11  ;;  %2034 = vrcp.f32 %v1023_v62  ;;  %v351_v62 = vld [vmem:[%s3325_s2 + $0x18] sm:$0xff] }
 0x184   :  { %v1886_v5 = vmul.f32 -1.442695, %v962_v18 }
 0x185   :  { %v597_v2 = vpop.permute.xlu0 %596  ;;  %v923_v9 = vpop.permute.xlu1 %922 }
 0x186   :  { %v963_v6 = vadd.f32 %v923_v9, %v803_v27  ;;  %v640_v19 = vadd.f32 %v597_v2, %v464_v54  ;;  %v470_v27 = vmul.f32 %v2690_v60, %v2560_v35  ;;  %v349_v35 = vld [vmem:[%s3325_s2 + $0x8] sm:$0xff] }
 0x187   :  { %v2029_v58 = vpop.eup %2028 }
 0x188   :  { %v1020_v61 = vadd.f32 1.0, %v2029_v58  ;;  %v1887_v49 = vmul.f32 -1.442695, %v963_v6 }
 0x189   :  { %v757_v7 = vpop.permute.xlu0 %756  ;;  %v599_v15 = vpop.permute.xlu1 %598 }
 0x18a   :  { %v800_v3 = vadd.f32 %v757_v7, %v640_v19  ;;  %2036 = vrcp.f32 %v1020_v61  ;;  %v641_v17 = vadd.f32 %v599_v15, %v465_v48  ;;  %v471_v61 = vmul.f32 %v2692_v16, %v2573_v8  ;;  %v348_v15 = vld [vmem:[%s3325_s2] sm:$0xff]  ;;  %v350_v19 = vld [vmem:[%s3325_s2 + $0x10] sm:$0xff] }
 0x18b   :  { %v2031_v44 = vpop.eup %2030  ;;  %2038 = vpow2.f32 %v1886_v5 }
 0x18c   :  { %v1021_v52 = vadd.f32 1.0, %v2031_v44  ;;  %v2718_v18 = vpop.eup %2032 }
 0x18d   :  { %v917_v50 = vpop.permute.xlu0 %916  ;;  %v759_v56 = vpop.permute.xlu1 %758 }
 0x18e   :  { %v960_v51 = vadd.f32 %v917_v50, %v800_v3  ;;  %2040 = vrcp.f32 %v1021_v52  ;;  %v801_v30 = vadd.f32 %v759_v56, %v641_v17 }
 0x18f   :  { %2042 = vpow2.f32 %v1887_v49  ;;  %v2722_v58 = vpop.eup %2034 }
 0x190   :  { %v1884_v14 = vmul.f32 -1.442695, %v960_v51  ;;  %v2743_v8 = vmul.f32 %v2722_v58, %v351_v62 }
 0x191   :  { %v919_v63 = vpop.permute.xlu1 %918  ;;  %v609_v11 = vpop.permute.xlu0 %608 }
 0x192   :  { %2044 = vpow2.f32 %v1884_v14  ;;  %v961_v20 = vadd.f32 %v919_v63, %v801_v30  ;;  %v646_v7 = vadd.f32 %v609_v11, %v470_v27  ;;  %v2752_v30 = vmul.f32 %v2718_v18, %v350_v19 }
 0x194   :  { %v1885_v2 = vmul.f32 -1.442695, %v961_v20  ;;  %v1101_v27 = vpack.c.bf16 %v2743_v8, %v2752_v30 }
 0x195   :  { %v769_v24 = vpop.permute.xlu0 %768  ;;  %v611_v9 = vpop.permute.xlu1 %610 }
 0x196   :  { %2046 = vpow2.f32 %v1885_v2  ;;  %v806_v48 = vadd.f32 %v769_v24, %v646_v7  ;;  %v647_v49 = vadd.f32 %v611_v9, %v471_v61  ;;  %v468_v2 = vmul.f32 %v2683_v26, %v2589_v28 }
 0x197   :  { %v2727_v6 = vpop.eup %2036 }
 0x198   :  { %3422 = vst [vmem:[#allocation40_spill] sm:$0xff] %v2727_v6  ;;  %v2039_v5 = vpop.eup %2038  ;;  %v2746_v56 = vmul.f32 %v2727_v6, %v348_v15 }
 0x199   :  { %v929_v34 = vpop.permute.xlu0 %928  ;;  %v771_v54 = vpop.permute.xlu1 %770  ;;  %v1026_v11 = vadd.f32 1.0, %v2039_v5 }
 0x19a   :  { %v966_v51 = vadd.f32 %v929_v34, %v806_v48  ;;  %v807_v14 = vadd.f32 %v771_v54, %v647_v49 }
 0x19b   :  { %v2740_v44 = vpop.eup %2040  ;;  %2048 = vrcp.f32 %v1026_v11 }
 0x19c   :  { %3423 = vst [vmem:[#allocation41_spill] sm:$0xff] %v2740_v44  ;;  %v2043_v3 = vpop.eup %2042  ;;  %v2749_v17 = vmul.f32 %v2740_v44, %v349_v35  ;;  %v1890_v61 = vmul.f32 -1.442695, %v966_v51  ;;  %v469_v35 = vmul.f32 %v2688_v13, %v2599_v1 }
 0x19d   :  { %v605_v52 = vpop.permute.xlu0 %604  ;;  %v931_v50 = vpop.permute.xlu1 %930  ;;  %v1027_v24 = vadd.f32 1.0, %v2043_v3 }
 0x19e   :  { %v1100_v20 = vpack.c.bf16 %v2749_v17, %v2746_v56  ;;  %v967_v9 = vadd.f32 %v931_v50, %v807_v14  ;;  %v644_v7 = vadd.f32 %v605_v52, %v468_v2 }
 0x19f   :  { %v2045_v63 = vpop.eup %2044  ;;  %2050 = vrcp.f32 %v1027_v24 }
 0x1a0   :  { %v1024_v62 = vadd.f32 1.0, %v2045_v63  ;;  %1963 = vmatprep.mubr.msk.bf16.mxu1 %vm1109_vm2, %v1100_v20  ;;  %v1891_v28 = vmul.f32 -1.442695, %v967_v9 }
 0x1a1   :  { %v765_v34 = vpop.permute.xlu0 %764  ;;  %v607_v54 = vpop.permute.xlu1 %606  ;;  %1964 = vmatmul.mubr.msk.bf16.vlgmr.msra.gmra.mxu1 %vm1109_vm2, %v1101_v27 }
 0x1a2   :  { %v804_v5 = vadd.f32 %v765_v34, %v644_v7  ;;  %2052 = vrcp.f32 %v1024_v62  ;;  %v645_v3 = vadd.f32 %v607_v54, %v469_v35  ;;  %v355_v34 = vld [vmem:[%s3325_s2 + $0x38] sm:$0xff]  ;;  %v353_v7 = vld [vmem:[%s3325_s2 + $0x28] sm:$0xff]  ;;  %v354_v35 = vld [vmem:[%s3325_s2 + $0x30] sm:$0xff] }
 0x1a3   :  { %v2047_v15 = vpop.eup %2046  ;;  %2054 = vpow2.f32 %v1890_v61  ;;  %v352_v61 = vld [vmem:[%s3325_s2 + $0x20] sm:$0xff] }
 0x1a4   :  { %v1025_v19 = vadd.f32 1.0, %v2047_v15 }
 0x1a5   :  { %v925_v48 = vpop.permute.xlu0 %924  ;;  %v767_v49 = vpop.permute.xlu1 %766 }
 0x1a6   :  { %v964_v50 = vadd.f32 %v925_v48, %v804_v5  ;;  %2056 = vrcp.f32 %v1025_v19  ;;  %v805_v51 = vadd.f32 %v767_v49, %v645_v3  ;;  %v472_v5 = vmul.f32 %v2694_v32, %v2639_v31 }
 0x1a7   :  { %2058 = vpow2.f32 %v1891_v28  ;;  %v474_v31 = vmul.f32 %v2698_v23, %v2617_v33 }
 0x1a8   :  { %v1888_v52 = vmul.f32 -1.442695, %v964_v50  ;;  %v2764_v24 = vpop.eup %2048 }
 0x1a9   :  { %v927_v14 = vpop.permute.xlu1 %926  ;;  %v617_v63 = vpop.permute.xlu0 %616  ;;  %3424 = vst [vmem:[#allocation42_spill] sm:$0xff] %v2764_v24 }
 0x1aa   :  { %2060 = vpow2.f32 %v1888_v52  ;;  %v965_v11 = vadd.f32 %v927_v14, %v805_v51  ;;  %v2796_v14 = vmul.f32 %v2764_v24, %v354_v35 }
 0x1ac   :  { %v1889_v20 = vmul.f32 -1.442695, %v965_v11  ;;  %v2766_v9 = vpop.eup %2050 }
 0x1ad   :  { %v777_v1 = vpop.permute.xlu0 %776  ;;  %v619_v2 = vpop.permute.xlu1 %618  ;;  %3425 = vst [vmem:[#allocation43_spill] sm:$0xff] %v2766_v9  ;;  %v2787_v19 = vmul.f32 %v2766_v9, %v355_v34  ;;  %v473_v9 = vmul.f32 %v2696_v12, %v2653_v36 }
 0x1ae   :  { %2062 = vpow2.f32 %v1889_v20 }
 0x1af   :  { %v2771_v54 = vpop.eup %2052 }
 0x1b0   :  { %3426 = vst [vmem:[#allocation44_spill] sm:$0xff] %v2771_v54  ;;  %v2055_v15 = vpop.eup %2054  ;;  %v2790_v50 = vmul.f32 %v2771_v54, %v352_v61 }
 0x1b1   :  { %v613_v27 = vpop.permute.xlu0 %612  ;;  %v779_v62 = vpop.permute.xlu1 %778  ;;  %v1030_v20 = vadd.f32 1.0, %v2055_v15  ;;  %v475_v15 = vmul.f32 %v2700_v0, %v2629_v10 }
 0x1b2   :  { %v648_v51 = vadd.f32 %v613_v27, %v472_v5 }
 0x1b3   :  { %v2782_v28 = vpop.eup %2056  ;;  %2064 = vrcp.f32 %v1030_v20  ;;  %v651_v6 = vadd.f32 %v619_v2, %v475_v15  ;;  %v359_v2 = vld [vmem:[%s3325_s2 + $0x58] sm:$0xff] }
 0x1b4   :  { %3427 = vst [vmem:[#allocation45_spill] sm:$0xff] %v2782_v28  ;;  %v2059_v48 = vpop.eup %2058  ;;  %v2793_v52 = vmul.f32 %v2782_v28, %v353_v7  ;;  %v1103_v7 = vpack.c.bf16 %v2787_v19, %v2796_v14  ;;  %v650_v28 = vadd.f32 %v617_v63, %v474_v31 }
 0x1b5   :  { %v773_v49 = vpop.permute.xlu0 %772  ;;  %v615_v3 = vpop.permute.xlu1 %614  ;;  %v1031_v61 = vadd.f32 1.0, %v2059_v48 }
 0x1b6   :  { %v1102_v34 = vpack.c.bf16 %v2793_v52, %v2790_v50  ;;  %v808_v54 = vadd.f32 %v773_v49, %v648_v51  ;;  %v649_v24 = vadd.f32 %v615_v3, %v473_v9  ;;  %v810_v48 = vadd.f32 %v777_v1, %v650_v28 }
 0x1b7   :  { %v2061_v11 = vpop.eup %2060  ;;  %2066 = vrcp.f32 %v1031_v61  ;;  %v811_v3 = vadd.f32 %v779_v62, %v651_v6  ;;  %v356_v6 = vld [vmem:[%s3325_s2 + $0x40] sm:$0xff]  ;;  %v357_v62 = vld [vmem:[%s3325_s2 + $0x48] sm:$0xff]  ;;  %v358_v61 = vld [vmem:[%s3325_s2 + $0x50] sm:$0xff] }
 0x1b8   :  { %v1028_v27 = vadd.f32 1.0, %v2061_v11  ;;  %1967 = vmatprep.mubr.msk.bf16.mxu1 %vm1109_vm2, %v1102_v34 }
 0x1b9   :  { %v933_v35 = vpop.permute.xlu0 %932  ;;  %v775_v5 = vpop.permute.xlu1 %774  ;;  %1968 = vmatmul.mubr.msk.bf16.gmra.mxu1 %vm1109_vm2, %v1103_v7 }
 0x1ba   :  { %v968_v33 = vadd.f32 %v933_v35, %v808_v54  ;;  %v809_v51 = vadd.f32 %v775_v5, %v649_v24  ;;  %2068 = vrcp.f32 %v1028_v27 }
 0x1bb   :  { %v2063_v36 = vpop.eup %2062 }
 0x1bc   :  { %v1892_v49 = vmul.f32 -1.442695, %v968_v33  ;;  %v1029_v11 = vadd.f32 1.0, %v2063_v36 }
 0x1bd   :  { %v937_v44 = vpop.permute.xlu0 %936  ;;  %v935_v34 = vpop.permute.xlu1 %934 }
 0x1be   :  { %2070 = vpow2.f32 %v1892_v49  ;;  %v970_v63 = vadd.f32 %v937_v44, %v810_v48  ;;  %v969_v9 = vadd.f32 %v935_v34, %v809_v51 }
 0x1bf   :  { %2072 = vrcp.f32 %v1029_v11 }
 0x1c0   :  { %v1894_v54 = vmul.f32 -1.442695, %v970_v63  ;;  %v1893_v31 = vmul.f32 -1.442695, %v969_v9  ;;  %v2810_v1 = vpop.eup %2064 }
 0x1c1   :  { %v939_v7 = vpop.permute.xlu1 %938  ;;  %v2840_v36 = vmul.f32 %v2810_v1, %v358_v61 }
 0x1c2   :  { %2074 = vpow2.f32 %v1894_v54  ;;  %v971_v10 = vadd.f32 %v939_v7, %v811_v3  ;;  %v361_v7 = vld [vmem:[%s3325_s2 + $0x68] sm:$0xff] }
 0x1c3   :  { %2076 = vpow2.f32 %v1893_v31  ;;  %v360_v31 = vld [vmem:[%s3325_s2 + $0x60] sm:$0xff] }
 0x1c4   :  { %v1895_v20 = vmul.f32 -1.442695, %v971_v10  ;;  %v2812_v24 = vpop.eup %2066 }
 0x1c5   :  { %v2831_v35 = vmul.f32 %v2812_v24, %v359_v2 }
 0x1c6   :  { %2078 = vpow2.f32 %v1895_v20 }
 0x1c7   :  { %v2817_v44 = vpop.eup %2068  ;;  %v1105_v34 = vpack.c.bf16 %v2831_v35, %v2840_v36 }
 0x1c8   :  { %v2834_v33 = vmul.f32 %v2817_v44, %v356_v6 }
 0x1cb   :  { %v2071_v28 = vpop.eup %2070 }
 0x1cc   :  { %v2828_v27 = vpop.eup %2072  ;;  %v1032_v5 = vadd.f32 1.0, %v2071_v28  ;;  %v363_v28 = vld [vmem:[%s3325_s2 + $0x78] sm:$0xff] }
 0x1cd   :  { %v2837_v15 = vmul.f32 %v2828_v27, %v357_v62  ;;  %v362_v62 = vld [vmem:[%s3325_s2 + $0x70] sm:$0xff] }
 0x1ce   :  { %2080 = vrcp.f32 %v1032_v5 }
 0x1cf   :  { %v2075_v48 = vpop.eup %2074  ;;  %v1104_v49 = vpack.c.bf16 %v2837_v15, %v2834_v33 }
 0x1d0   :  { %v2077_v51 = vpop.eup %2076  ;;  %v1034_v11 = vadd.f32 1.0, %v2075_v48 }
 0x1d1   :  { %v1033_v63 = vadd.f32 1.0, %v2077_v51  ;;  %1971 = vmatprep.mubr.msk.bf16.mxu1 %vm1109_vm2, %v1104_v49 }
 0x1d2   :  { %1972 = vmatmul.mubr.msk.bf16.gmra.mxu1 %vm1109_vm2, %v1105_v34 }
 0x1d3   :  { %v2079_v9 = vpop.eup %2078  ;;  %2082 = vrcp.f32 %v1033_v63 }
 0x1d4   :  { %2084 = vrcp.f32 %v1034_v11  ;;  %v1035_v3 = vadd.f32 1.0, %v2079_v9  ;;  %v1086_v11 = vld [vmem:[%s3326_s4 + $0x10] sm:$0xff] }
 0x1d6   :  { %2086 = vrcp.f32 %v1035_v3  ;;  %v1087_v3 = vld [vmem:[%s3326_s4 + $0x18] sm:$0xff] }
 0x1db   :  { %v2848_v54 = vpop.eup %2080 }
 0x1dc   :  { %3428 = vst [vmem:[#allocation46_spill] sm:$0xff] %v2848_v54  ;;  %v2861_v2 = vmul.f32 %v2848_v54, %v360_v31  ;;  %v3462_v54 = vld [vmem:[#allocation28_spill] sm:$0xff] }
 0x1e0   :  { %v2856_v10 = vpop.eup %2082 }
 0x1e1   :  { %3429 = vst [vmem:[#allocation47_spill] sm:$0xff] %v2856_v10  ;;  %v2858_v20 = vpop.eup %2084  ;;  %v2864_v6 = vmul.f32 %v2856_v10, %v361_v7 }
 0x1e2   :  { %3430 = vst [vmem:[#allocation48_spill] sm:$0xff] %v2858_v20  ;;  %v2877_v48 = vmul.f32 %v2858_v20, %v362_v62 }
 0x1e3   :  { %v2872_v61 = vpop.eup %2086  ;;  %v1106_v5 = vpack.c.bf16 %v2864_v6, %v2861_v2 }
 0x1e4   :  { %3431 = vst [vmem:[#allocation49_spill] sm:$0xff] %v2872_v61  ;;  %v2880_v49 = vmul.f32 %v2872_v61, %v363_v28  ;;  %v3456_v61 = vld [vmem:[#allocation35_spill] sm:$0xff] }
 0x1e5   :  { %1975 = vmatprep.mubr.msk.bf16.mxu1 %vm1109_vm2, %v1106_v5 }
 0x1e6   :  { %v1107_v51 = vpack.c.bf16 %v2880_v49, %v2877_v48 }
 0x1e8   :  { %1976 = vmatmul.mubr.msk.bf16.gmra.mxu1 %vm1109_vm2, %v1107_v51  ;;  %v1084_v51 = vld [vmem:[%s3326_s4] sm:$0xff] }
 0x261   :  { %v1965_v34 = vpop.f32.mrf.mxu1 }
 0x262   :  { %v2889_v63 = vadd.f32 %v1965_v34, %v1086_v11 }
 0x263   :  { %v1172_v9 = vpop.f32.mrf.mxu1 }
 0x264   :  { %v1285_v31 = vmul.f32 %v2889_v63, %v2372_v37  ;;  %v1381_v28 = vmul.f32 %v2889_v63, %v2383_v40  ;;  %v2908_v37 = vadd.f32 %v1172_v9, %v1084_v51  ;;  %v1477_v11 = vmul.f32 %v2889_v63, %v2389_v42 }
 0x265   :  { %v1966_v7 = vpop.f32.mrf.mxu1 }
 0x266   :  { %v2896_v62 = vadd.f32 %v1966_v7, %v1087_v3  ;;  %1319 = vrot.lane.b32.xlu0 %v1285_v31, %s2127_s28  ;;  %v1283_v9 = vmul.f32 %v2908_v37, %v2395_v45  ;;  %v1090_v45 = vld [vmem:[%s3326_s4 + $0x30] sm:$0xff] }
 0x267   :  { %v1175_v40 = vpop.f32.mrf.mxu1 }
 0x268   :  { %v1286_v5 = vmul.f32 %v2896_v62, %v2376_v38  ;;  %v1382_v34 = vmul.f32 %v2896_v62, %v2428_v4  ;;  %v1085_v38 = vld [vmem:[%s3326_s4 + $0x8] sm:$0xff]  ;;  %v1478_v42 = vmul.f32 %v2896_v62, %v2391_v43  ;;  %v1379_v4 = vmul.f32 %v2908_v37, %v2423_v59  ;;  %v1091_v59 = vld [vmem:[%s3326_s4 + $0x38] sm:$0xff] }
 0x269   :  { %v2919_v3 = vadd.f32 %v1175_v40, %v1085_v38  ;;  %v1475_v43 = vmul.f32 %v2908_v37, %v2386_v41  ;;  %v3433_v38 = vld [vmem:[#allocation6_spill] sm:$0xff] }
 0x26a   :  { %1415 = vrot.lane.b32.xlu0 %v1381_v28, %s2124_s3  ;;  %1321 = vrot.lane.b32.xlu1 %v1286_v5, %s2127_s28 }
 0x26b   :  { %v1284_v31 = vmul.f32 %v2919_v3, %v2399_v47  ;;  %v1380_v7 = vmul.f32 %v2919_v3, %v2379_v39 }
 0x26e   :  { %1511 = vrot.lane.b32.xlu0 %v1477_v11, %s2128_s10  ;;  %1417 = vrot.lane.b32.xlu1 %v1382_v34, %s2124_s3  ;;  %v3432_v11 = vld [vmem:[#allocation25_spill] sm:$0xff] }
 0x26f   :  { %v1476_v41 = vmul.f32 %v2919_v3, %v3432_v11  ;;  %v3437_v11 = vld [vmem:[#allocation5_spill] sm:$0xff] }
 0x272   :  { %1315 = vrot.lane.b32.xlu0 %v1283_v9, %s2127_s28  ;;  %1513 = vrot.lane.b32.xlu1 %v1478_v42, %s2128_s10  ;;  %v3434_v9 = vld [vmem:[#allocation7_spill] sm:$0xff] }
 0x276   :  { %1411 = vrot.lane.b32.xlu0 %v1379_v4, %s2124_s3  ;;  %1317 = vrot.lane.b32.xlu1 %v1284_v31, %s2127_s28  ;;  %v3435_v31 = vld [vmem:[#allocation12_spill] sm:$0xff] }
 0x279   :  { %v1969_v28 = vpop.f32.mrf.mxu1 }
 0x27a   :  { %v2940_v5 = vadd.f32 %v1969_v28, %v1090_v45  ;;  %1507 = vrot.lane.b32.xlu0 %v1475_v43, %s2128_s10  ;;  %1413 = vrot.lane.b32.xlu1 %v1380_v7, %s2124_s3  ;;  %v3436_v43 = vld [vmem:[#allocation8_spill] sm:$0xff] }
 0x27b   :  { %v1188_v47 = vpop.f32.mrf.mxu1  ;;  %v1089_v28 = vld [vmem:[%s3326_s4 + $0x28] sm:$0xff] }
 0x27c   :  { %v1289_v51 = vmul.f32 %v2940_v5, %v2397_v46  ;;  %v1385_v40 = vmul.f32 %v2940_v5, %v3433_v38  ;;  %v1088_v46 = vld [vmem:[%s3326_s4 + $0x20] sm:$0xff]  ;;  %v1481_v45 = vmul.f32 %v2940_v5, %v3435_v31  ;;  %v3439_v38 = vld [vmem:[#allocation4_spill] sm:$0xff] }
 0x27d   :  { %v1970_v34 = vpop.f32.mrf.mxu1  ;;  %v2964_v4 = vadd.f32 %v1188_v47, %v1088_v46  ;;  %v1094_v46 = vld [vmem:[%s3326_s4 + $0x50] sm:$0xff]  ;;  %v3441_v31 = vld [vmem:[#allocation27_spill] sm:$0xff] }
 0x27e   :  { %v2951_v39 = vadd.f32 %v1970_v34, %v1091_v59  ;;  %1327 = vrot.lane.b32.xlu0 %v1289_v51, %s2127_s28  ;;  %1509 = vrot.lane.b32.xlu1 %v1476_v41, %s2128_s10  ;;  %v3438_v41 = vld [vmem:[#allocation29_spill] sm:$0xff] }
 0x27f   :  { %v1191_v59 = vpop.f32.mrf.mxu1  ;;  %v1287_v47 = vmul.f32 %v2964_v4, %v3437_v11 }
 0x280   :  { %v1290_v42 = vmul.f32 %v2951_v39, %v3434_v9  ;;  %v1386_v7 = vmul.f32 %v2951_v39, %v3436_v43  ;;  %v2975_v51 = vadd.f32 %v1191_v59, %v1089_v28  ;;  %v1482_v34 = vmul.f32 %v2951_v39, %v3438_v41  ;;  %v3440_v9 = vld [vmem:[#allocation3_spill] sm:$0xff]  ;;  %v3442_v43 = vld [vmem:[#allocation17_spill] sm:$0xff] }
 0x281   :  { %v3443_v41 = vld [vmem:[#allocation15_spill] sm:$0xff] }
 0x282   :  { %1423 = vrot.lane.b32.xlu0 %v1385_v40, %s2124_s3  ;;  %1329 = vrot.lane.b32.xlu1 %v1290_v42, %s2127_s28  ;;  %v1383_v40 = vmul.f32 %v2964_v4, %v3439_v38  ;;  %v1288_v42 = vmul.f32 %v2975_v51, %v3440_v9  ;;  %v3444_v38 = vld [vmem:[#allocation10_spill] sm:$0xff] }
 0x286   :  { %1519 = vrot.lane.b32.xlu0 %v1481_v45, %s2128_s10  ;;  %1425 = vrot.lane.b32.xlu1 %v1386_v7, %s2124_s3  ;;  %v1479_v45 = vmul.f32 %v2964_v4, %v3441_v31  ;;  %v1384_v7 = vmul.f32 %v2975_v51, %v3442_v43 }
 0x28a   :  { %1323 = vrot.lane.b32.xlu0 %v1287_v47, %s2127_s28  ;;  %1521 = vrot.lane.b32.xlu1 %v1482_v34, %s2128_s10  ;;  %v1095_v47 = vld [vmem:[%s3326_s4 + $0x58] sm:$0xff] }
 0x28e   :  { %1419 = vrot.lane.b32.xlu0 %v1383_v40, %s2124_s3  ;;  %1325 = vrot.lane.b32.xlu1 %v1288_v42, %s2127_s28  ;;  %v1480_v40 = vmul.f32 %v2975_v51, %v3444_v38 }
 0x292   :  { %v1973_v28 = vpop.f32.mrf.mxu1  ;;  %1515 = vrot.lane.b32.xlu0 %v1479_v45, %s2128_s10  ;;  %1421 = vrot.lane.b32.xlu1 %v1384_v7, %s2124_s3  ;;  %v3446_v45 = vld [vmem:[#allocation16_spill] sm:$0xff]  ;;  %v1092_v7 = vld [vmem:[%s3326_s4 + $0x40] sm:$0xff] }
 0x293   :  { %v2996_v59 = vadd.f32 %v1973_v28, %v1094_v46  ;;  %v3445_v46 = vld [vmem:[#allocation20_spill] sm:$0xff] }
 0x294   :  { %v1204_v11 = vpop.f32.mrf.mxu1 }
 0x295   :  { %v1293_v34 = vmul.f32 %v2996_v59, %v3443_v41  ;;  %v1389_v31 = vmul.f32 %v2996_v59, %v3445_v46  ;;  %v3020_v28 = vadd.f32 %v1204_v11, %v1092_v7  ;;  %v3451_v7 = vld [vmem:[#allocation19_spill] sm:$0xff] }
 0x296   :  { %v1974_v9 = vpop.f32.mrf.mxu1  ;;  %1517 = vrot.lane.b32.xlu1 %v1480_v40, %s2128_s10  ;;  %v1093_v40 = vld [vmem:[%s3326_s4 + $0x48] sm:$0xff] }
 0x297   :  { %v3007_v42 = vadd.f32 %v1974_v9, %v1095_v47  ;;  %1335 = vrot.lane.b32.xlu0 %v1293_v34, %s2127_s28  ;;  %v3447_v47 = vld [vmem:[#allocation24_spill] sm:$0xff]  ;;  %v3448_v34 = vld [vmem:[#allocation21_spill] sm:$0xff] }
 0x298   :  { %v1485_v41 = vmul.f32 %v2996_v59, %v3447_v47  ;;  %v1207_v9 = vpop.f32.mrf.mxu1  ;;  %v1387_v47 = vmul.f32 %v3020_v28, %v3451_v7 }
 0x299   :  { %v1294_v43 = vmul.f32 %v3007_v42, %v3446_v45  ;;  %v1390_v38 = vmul.f32 %v3007_v42, %v3448_v34  ;;  %v3031_v46 = vadd.f32 %v1207_v9, %v1093_v40  ;;  %v3450_v45 = vld [vmem:[#allocation26_spill] sm:$0xff]  ;;  %v3452_v34 = vld [vmem:[#allocation9_spill] sm:$0xff] }
 0x29b   :  { %1431 = vrot.lane.b32.xlu0 %v1389_v31, %s2124_s3  ;;  %1337 = vrot.lane.b32.xlu1 %v1294_v43, %s2127_s28  ;;  %v3449_v31 = vld [vmem:[#allocation14_spill] sm:$0xff]  ;;  %v1486_v43 = vmul.f32 %v3007_v42, %v3450_v45 }
 0x29c   :  { %v1291_v11 = vmul.f32 %v3020_v28, %v3449_v31  ;;  %v3453_v31 = vld [vmem:[#allocation22_spill] sm:$0xff] }
 0x29d   :  { %v3454_v45 = vld [vmem:[#allocation18_spill] sm:$0xff] }
 0x29f   :  { %1527 = vrot.lane.b32.xlu0 %v1485_v41, %s2128_s10  ;;  %1433 = vrot.lane.b32.xlu1 %v1390_v38, %s2124_s3  ;;  %v1292_v41 = vmul.f32 %v3031_v46, %v3452_v34  ;;  %v1098_v38 = vld [vmem:[%s3326_s4 + $0x70] sm:$0xff]  ;;  %v1099_v34 = vld [vmem:[%s3326_s4 + $0x78] sm:$0xff] }
 0x2a3   :  { %1331 = vrot.lane.b32.xlu0 %v1291_v11, %s2127_s28  ;;  %1529 = vrot.lane.b32.xlu1 %v1486_v43, %s2128_s10  ;;  %v1483_v11 = vmul.f32 %v3020_v28, %v3453_v31  ;;  %v1388_v43 = vmul.f32 %v3031_v46, %v3454_v45  ;;  %v1484_v31 = vmul.f32 %v3031_v46, %v3456_v61  ;;  %v1096_v45 = vld [vmem:[%s3326_s4 + $0x60] sm:$0xff]  ;;  %v1097_v61 = vld [vmem:[%s3326_s4 + $0x68] sm:$0xff]  ;;  %s2129_s4 = smov 8  }
 0x2a7   :  { %1427 = vrot.lane.b32.xlu0 %v1387_v47, %s2124_s3  ;;  %1333 = vrot.lane.b32.xlu1 %v1292_v41, %s2127_s28  ;;  %v3455_v47 = vld [vmem:[#allocation30_spill] sm:$0xff] }
 0x2a8   :  { %v1977_v40 = vpop.f32.mrf.mxu1 }
 0x2a9   :  { %v3048_v9 = vadd.f32 %v1977_v40, %v1098_v38 }
 0x2aa   :  { %v1220_v7 = vpop.f32.mrf.mxu1 }
 0x2ab   :  { %1523 = vrot.lane.b32.xlu0 %v1483_v11, %s2128_s10  ;;  %1429 = vrot.lane.b32.xlu1 %v1388_v43, %s2124_s3  ;;  %v1297_v41 = vmul.f32 %v3048_v9, %v3455_v47  ;;  %v3457_v11 = vld [vmem:[#allocation13_spill] sm:$0xff]  ;;  %v3072_v10 = vadd.f32 %v1220_v7, %v1096_v45  ;;  %v3458_v47 = vld [vmem:[#allocation32_spill] sm:$0xff]  ;;  %v3461_v45 = vld [vmem:[#allocation31_spill] sm:$0xff] }
 0x2ac   :  { %v1978_v38 = vpop.f32.mrf.mxu1 }
 0x2ad   :  { %v3061_v40 = vadd.f32 %v1978_v38, %v1099_v34  ;;  %v1393_v34 = vmul.f32 %v3048_v9, %v3458_v47  ;;  %v1391_v47 = vmul.f32 %v3072_v10, %v3461_v45  ;;  %v3467_v45 = vld [vmem:[#allocation38_spill] sm:$0xff] }
 0x2ae   :  { %v1223_v38 = vpop.f32.mrf.mxu1 }
 0x2af   :  { %1525 = vrot.lane.b32.xlu1 %v1484_v31, %s2128_s10  ;;  %1343 = vrot.lane.b32.xlu0 %v1297_v41, %s2127_s28  ;;  %v1298_v43 = vmul.f32 %v3061_v40, %v3457_v11  ;;  %v3081_v31 = vadd.f32 %v1223_v38, %v1097_v61  ;;  %v3459_v41 = vld [vmem:[#allocation11_spill] sm:$0xff]  ;;  %v3460_v11 = vld [vmem:[#allocation33_spill] sm:$0xff] }
 0x2b0   :  { %v1295_v20 = vmul.f32 %v3072_v10, %v3459_v41  ;;  %v1394_v7 = vmul.f32 %v3061_v40, %v3460_v11  ;;  %v3464_v38 = vld [vmem:[#allocation23_spill] sm:$0xff] }
 0x2b1   :  { %v1392_v41 = vmul.f32 %v3081_v31, %v3464_v38 }
 0x2b3   :  { %1439 = vrot.lane.b32.xlu0 %v1393_v34, %s2124_s3  ;;  %1345 = vrot.lane.b32.xlu1 %v1298_v43, %s2127_s28  ;;  %v1296_v34 = vmul.f32 %v3081_v31, %v3462_v54  ;;  %v3463_v43 = vld [vmem:[#allocation37_spill] sm:$0xff] }
 0x2b4   :  { %v1487_v61 = vmul.f32 %v3072_v10, %v3463_v43 }
 0x2b7   :  { %1339 = vrot.lane.b32.xlu0 %v1295_v20, %s2127_s28  ;;  %1441 = vrot.lane.b32.xlu1 %v1394_v7, %s2124_s3  ;;  %v3465_v20 = vld [vmem:[#allocation36_spill] sm:$0xff]  ;;  %v3466_v7 = vld [vmem:[#allocation34_spill] sm:$0xff] }
 0x2b8   :  { %v1489_v11 = vmul.f32 %v3048_v9, %v3465_v20  ;;  %v1488_v54 = vmul.f32 %v3081_v31, %v3466_v7 }
 0x2bb   :  { %1435 = vrot.lane.b32.xlu0 %v1391_v47, %s2124_s3  ;;  %1341 = vrot.lane.b32.xlu1 %v1296_v34, %s2127_s28  ;;  %v1490_v47 = vmul.f32 %v3061_v40, %v3467_v45 }
 0x2bf   :  { %1531 = vrot.lane.b32.xlu0 %v1487_v61, %s2128_s10  ;;  %1437 = vrot.lane.b32.xlu1 %v1392_v41, %s2124_s3 }
 0x2c3   :  { %1535 = vrot.lane.b32.xlu0 %v1489_v11, %s2128_s10  ;;  %1533 = vrot.lane.b32.xlu1 %v1488_v54, %s2128_s10 }
 0x2c7   :  { %1619 = vrot.lane.b32.xlu0 %v2746_v56, %s2129_s4  ;;  %1537 = vrot.lane.b32.xlu1 %v1490_v47, %s2128_s10 }
 0x2cb   :  { %1623 = vrot.lane.b32.xlu0 %v2752_v30, %s2129_s4  ;;  %1621 = vrot.lane.b32.xlu1 %v2749_v17, %s2129_s4 }
 0x2cf   :  { %1627 = vrot.lane.b32.xlu0 %v2790_v50, %s2129_s4  ;;  %1625 = vrot.lane.b32.xlu1 %v2743_v8, %s2129_s4  ;;  %v3468_v8 = vld [vmem:[#allocation39_spill] sm:$0xff] }
 0x2d0   :  { %v1253_v17 = vmul.f32 %v2889_v63, %v3468_v8 }
 0x2d3   :  { %1631 = vrot.lane.b32.xlu0 %v2796_v14, %s2129_s4  ;;  %1629 = vrot.lane.b32.xlu1 %v2793_v52, %s2129_s4  ;;  %v1254_v52 = vmul.f32 %v2896_v62, %v2655_v57  ;;  %v1251_v57 = vmul.f32 %v2908_v37, %v2623_v53  ;;  %v1257_v53 = vmul.f32 %v2940_v5, %v2673_v29 }
 0x2d7   :  { %1635 = vrot.lane.b32.xlu0 %v2834_v33, %s2129_s4  ;;  %1633 = vrot.lane.b32.xlu1 %v2787_v19, %s2129_s4 }
 0x2d8   :  { %v1320_v56 = vpop.permute.xlu0 %1319 }
 0x2d9   :  { %v1365_v14 = vadd.f32 %v1320_v56, %v1253_v17 }
 0x2db   :  { %1639 = vrot.lane.b32.xlu0 %v2840_v36, %s2129_s4  ;;  %1637 = vrot.lane.b32.xlu1 %v2837_v15, %s2129_s4 }
 0x2dc   :  { %v1416_v30 = vpop.permute.xlu0 %1415  ;;  %v1322_v50 = vpop.permute.xlu1 %1321 }
 0x2dd   :  { %v1461_v19 = vadd.f32 %v1416_v30, %v1365_v14  ;;  %v1366_v34 = vadd.f32 %v1322_v50, %v1254_v52  ;;  %v1258_v30 = vmul.f32 %v2951_v39, %v2681_v25 }
 0x2df   :  { %1643 = vrot.lane.b32.xlu0 %v2861_v2, %s2129_s4  ;;  %1641 = vrot.lane.b32.xlu1 %v2831_v35, %s2129_s4 }
 0x2e0   :  { %v1512_v33 = vpop.permute.xlu0 %1511  ;;  %v1418_v36 = vpop.permute.xlu1 %1417 }
 0x2e1   :  { %v1557_v15 = vadd.f32 %v1512_v33, %v1461_v19  ;;  %v1462_v63 = vadd.f32 %v1418_v36, %v1366_v34 }
 0x2e3   :  { %1647 = vrot.lane.b32.xlu0 %v2877_v48, %s2129_s4  ;;  %1645 = vrot.lane.b32.xlu1 %v2864_v6, %s2129_s4  ;;  %2088 = vtanh.f32 %v1557_v15  ;;  %v1252_v48 = vmul.f32 %v2919_v3, %v2649_v21  ;;  %v1255_v15 = vmul.f32 %v2964_v4, %v2661_v55 }
 0x2e4   :  { %v1316_v2 = vpop.permute.xlu0 %1315  ;;  %v1514_v43 = vpop.permute.xlu1 %1513 }
 0x2e5   :  { %v1558_v61 = vadd.f32 %v1514_v43, %v1462_v63  ;;  %v1363_v38 = vadd.f32 %v1316_v2, %v1251_v57 }
 0x2e7   :  { %1649 = vrot.lane.b32.xlu1 %v2880_v49, %s2129_s4  ;;  %2090 = vtanh.f32 %v1558_v61  ;;  %v1256_v61 = vmul.f32 %v2975_v51, %v2669_v22 }
 0x2e8   :  { %v1412_v35 = vpop.permute.xlu0 %1411  ;;  %v1318_v62 = vpop.permute.xlu1 %1317 }
 0x2e9   :  { %v1459_v41 = vadd.f32 %v1412_v35, %v1363_v38  ;;  %v1364_v11 = vadd.f32 %v1318_v62, %v1252_v48 }
 0x2ec   :  { %v1508_v6 = vpop.permute.xlu0 %1507  ;;  %v1414_v20 = vpop.permute.xlu1 %1413 }
 0x2ed   :  { %v1555_v7 = vadd.f32 %v1508_v6, %v1459_v41  ;;  %v1460_v54 = vadd.f32 %v1414_v20, %v1364_v11  ;;  %v1261_v20 = vmul.f32 %v2996_v59, %v2690_v60 }
 0x2ef   :  { %2092 = vtanh.f32 %v1555_v7 }
 0x2f0   :  { %v2089_v45 = vpop.eup %2088  ;;  %v1328_v47 = vpop.permute.xlu0 %1327 }
 0x2f1   :  { %v1510_v49 = vpop.permute.xlu1 %1509  ;;  %1703 = vrot.lane.b32.xlu0 %v2089_v45, %s2129_s4  ;;  %v1369_v21 = vadd.f32 %v1328_v47, %v1257_v53  ;;  %v1262_v45 = vmul.f32 %v3007_v42, %v2692_v16 }
 0x2f2   :  { %v1556_v56 = vadd.f32 %v1510_v49, %v1460_v54 }
 0x2f4   :  { %2094 = vtanh.f32 %v1556_v56  ;;  %v2091_v37 = vpop.eup %2090  ;;  %v1424_v8 = vpop.permute.xlu0 %1423 }
 0x2f5   :  { %v1330_v17 = vpop.permute.xlu1 %1329  ;;  %1705 = vrot.lane.b32.xlu1 %v2091_v37, %s2129_s4  ;;  %v1465_v3 = vadd.f32 %v1424_v8, %v1369_v21  ;;  %v1259_v21 = vmul.f32 %v3020_v28, %v2683_v26 }
 0x2f6   :  { %v1370_v19 = vadd.f32 %v1330_v17, %v1258_v30 }
 0x2f8   :  { %v1520_v50 = vpop.permute.xlu0 %1519 }
 0x2f9   :  { %v1426_v14 = vpop.permute.xlu1 %1425  ;;  %v1561_v52 = vadd.f32 %v1520_v50, %v1465_v3 }
 0x2fa   :  { %v1466_v33 = vadd.f32 %v1426_v14, %v1370_v19  ;;  %v1260_v14 = vmul.f32 %v3031_v46, %v2688_v13  ;;  %v1263_v46 = vmul.f32 %v3072_v10, %v2694_v32  ;;  %v1266_v10 = vmul.f32 %v3061_v40, %v2700_v0 }
 0x2fb   :  { %2096 = vtanh.f32 %v1561_v52 }
 0x2fc   :  { %v2093_v36 = vpop.eup %2092  ;;  %v1324_v34 = vpop.permute.xlu0 %1323 }
 0x2fd   :  { %v1522_v29 = vpop.permute.xlu1 %1521  ;;  %1699 = vrot.lane.b32.xlu0 %v2093_v36, %s2129_s4  ;;  %v1367_v25 = vadd.f32 %v1324_v34, %v1255_v15 }
 0x2fe   :  { %v1562_v5 = vadd.f32 %v1522_v29, %v1466_v33 }
 0x300   :  { %2098 = vtanh.f32 %v1562_v5  ;;  %v1420_v2 = vpop.permute.xlu0 %1419 }
 0x301   :  { %v2095_v63 = vpop.eup %2094  ;;  %v1326_v43 = vpop.permute.xlu1 %1325  ;;  %v1463_v39 = vadd.f32 %v1420_v2, %v1367_v25 }
 0x302   :  { %1701 = vrot.lane.b32.xlu1 %v2095_v63, %s2129_s4  ;;  %v1368_v62 = vadd.f32 %v1326_v43, %v1256_v61 }
 0x304   :  { %v1516_v57 = vpop.permute.xlu0 %1515 }
 0x305   :  { %v1422_v35 = vpop.permute.xlu1 %1421  ;;  %v1559_v38 = vadd.f32 %v1516_v57, %v1463_v39 }
 0x306   :  { %v1464_v41 = vadd.f32 %v1422_v35, %v1368_v62  ;;  %v1265_v35 = vmul.f32 %v3048_v9, %v2698_v23 }
 0x307   :  { %2100 = vtanh.f32 %v1559_v38  ;;  %v1264_v38 = vmul.f32 %v3081_v31, %v2696_v12 }
 0x308   :  { %v2097_v48 = vpop.eup %2096 }
 0x309   :  { %v1336_v6 = vpop.permute.xlu0 %1335  ;;  %v1518_v55 = vpop.permute.xlu1 %1517  ;;  %1711 = vrot.lane.b32.xlu0 %v2097_v48, %s2129_s4 }
 0x30a   :  { %v1560_v4 = vadd.f32 %v1518_v55, %v1464_v41  ;;  %v1373_v22 = vadd.f32 %v1336_v6, %v1261_v20 }
 0x30c   :  { %2102 = vtanh.f32 %v1560_v4 }
 0x30d   :  { %v2099_v11 = vpop.eup %2098  ;;  %v1432_v7 = vpop.permute.xlu0 %1431 }
 0x30e   :  { %v1338_v54 = vpop.permute.xlu1 %1337  ;;  %1713 = vrot.lane.b32.xlu1 %v2099_v11, %s2129_s4  ;;  %v1469_v51 = vadd.f32 %v1432_v7, %v1373_v22 }
 0x30f   :  { %v1374_v56 = vadd.f32 %v1338_v54, %v1262_v45 }
 0x311   :  { %v1528_v47 = vpop.permute.xlu0 %1527 }
 0x312   :  { %v1434_v49 = vpop.permute.xlu1 %1433  ;;  %v1565_v53 = vadd.f32 %v1528_v47, %v1469_v51 }
 0x313   :  { %v1470_v37 = vadd.f32 %v1434_v49, %v1374_v56 }
 0x314   :  { %2104 = vtanh.f32 %v1565_v53  ;;  %v2101_v8 = vpop.eup %2100 }
 0x315   :  { %v1332_v17 = vpop.permute.xlu0 %1331  ;;  %1707 = vrot.lane.b32.xlu0 %v2101_v8, %s2129_s4 }
 0x316   :  { %v1530_v60 = vpop.permute.xlu1 %1529  ;;  %v1371_v16 = vadd.f32 %v1332_v17, %v1259_v21 }
 0x317   :  { %v1566_v59 = vadd.f32 %v1530_v60, %v1470_v37 }
 0x319   :  { %2106 = vtanh.f32 %v1566_v59  ;;  %v2103_v3 = vpop.eup %2102  ;;  %v1428_v30 = vpop.permute.xlu0 %1427 }
 0x31a   :  { %v1334_v50 = vpop.permute.xlu1 %1333  ;;  %1709 = vrot.lane.b32.xlu1 %v2103_v3, %s2129_s4  ;;  %v1467_v42 = vadd.f32 %v1428_v30, %v1371_v16 }
 0x31b   :  { %v1372_v33 = vadd.f32 %v1334_v50, %v1260_v14 }
 0x31d   :  { %v1524_v19 = vpop.permute.xlu0 %1523 }
 0x31e   :  { %v1430_v52 = vpop.permute.xlu1 %1429  ;;  %v1563_v36 = vadd.f32 %v1524_v19, %v1467_v42  ;;  %v1589_v19 = vsub.f32 1.0, %v2718_v18 }
 0x31f   :  { %v1468_v34 = vadd.f32 %v1430_v52, %v1372_v33 }
 0x320   :  { %2108 = vtanh.f32 %v1563_v36 }
 0x321   :  { %v2105_v29 = vpop.eup %2104  ;;  %v1344_v26 = vpop.permute.xlu0 %1343 }
 0x322   :  { %v1526_v5 = vpop.permute.xlu1 %1525  ;;  %1719 = vrot.lane.b32.xlu0 %v2105_v29, %s2129_s4  ;;  %v1377_v55 = vadd.f32 %v1344_v26, %v1265_v35  ;;  %v1590_v29 = vsub.f32 1.0, %v2722_v58 }
 0x323   :  { %v1564_v28 = vadd.f32 %v1526_v5, %v1468_v34 }
 0x325   :  { %2110 = vtanh.f32 %v1564_v28  ;;  %v1440_v63 = vpop.permute.xlu0 %1439 }
 0x326   :  { %v2107_v15 = vpop.eup %2106  ;;  %v1346_v2 = vpop.permute.xlu1 %1345  ;;  %v1473_v32 = vadd.f32 %v1440_v63, %v1377_v55 }
 0x327   :  { %1721 = vrot.lane.b32.xlu1 %v2107_v15, %s2129_s4  ;;  %v1378_v9 = vadd.f32 %v1346_v2, %v1266_v10  ;;  %v3469_v2 = vld [vmem:[#allocation40_spill] sm:$0xff] }
 0x329   :  { %v1340_v43 = vpop.permute.xlu0 %1339 }
 0x32a   :  { %v1442_v13 = vpop.permute.xlu1 %1441  ;;  %v1375_v57 = vadd.f32 %v1340_v43, %v1263_v46  ;;  %v1587_v43 = vsub.f32 1.0, %v3469_v2 }
 0x32b   :  { %v1474_v12 = vadd.f32 %v1442_v13, %v1378_v9  ;;  %v3473_v9 = vld [vmem:[#allocation44_spill] sm:$0xff] }
 0x32d   :  { %v2109_v25 = vpop.eup %2108  ;;  %v1436_v39 = vpop.permute.xlu0 %1435 }
 0x32e   :  { %v1342_v61 = vpop.permute.xlu1 %1341  ;;  %1715 = vrot.lane.b32.xlu0 %v2109_v25, %s2129_s4  ;;  %v1471_v62 = vadd.f32 %v1436_v39, %v1375_v57  ;;  %v3470_v39 = vld [vmem:[#allocation41_spill] sm:$0xff] }
 0x32f   :  { %v1376_v4 = vadd.f32 %v1342_v61, %v1264_v38  ;;  %v3471_v38 = vld [vmem:[#allocation42_spill] sm:$0xff] }
 0x331   :  { %v1532_v48 = vpop.permute.xlu0 %1531 }
 0x332   :  { %v2111_v41 = vpop.eup %2110  ;;  %v1438_v6 = vpop.permute.xlu1 %1437  ;;  %v1567_v20 = vadd.f32 %v1532_v48, %v1471_v62 }
 0x333   :  { %1717 = vrot.lane.b32.xlu1 %v2111_v41, %s2129_s4  ;;  %v1472_v11 = vadd.f32 %v1438_v6, %v1376_v4  ;;  %v1593_v41 = vsub.f32 1.0, %v3471_v38  ;;  %v3472_v4 = vld [vmem:[#allocation43_spill] sm:$0xff] }
 0x334   :  { %2112 = vtanh.f32 %v1567_v20  ;;  %v1594_v20 = vsub.f32 1.0, %v3472_v4 }
 0x335   :  { %v1536_v7 = vpop.permute.xlu0 %1535 }
 0x336   :  { %v1534_v23 = vpop.permute.xlu1 %1533  ;;  %v1569_v54 = vadd.f32 %v1536_v7, %v1473_v32 }
 0x337   :  { %v1568_v22 = vadd.f32 %v1534_v23, %v1472_v11 }
 0x338   :  { %2114 = vtanh.f32 %v1569_v54  ;;  %v1591_v54 = vsub.f32 1.0, %v3473_v9 }
 0x339   :  { %2116 = vtanh.f32 %v1568_v22  ;;  %v1620_v31 = vpop.permute.xlu0 %1619 }
 0x33a   :  { %v1538_v51 = vpop.permute.xlu1 %1537  ;;  %v1667_v46 = vmul.f32 %v1620_v31, %v1587_v43 }
 0x33b   :  { %v1570_v45 = vadd.f32 %v1538_v51, %v1474_v12  ;;  %v3474_v51 = vld [vmem:[#allocation45_spill] sm:$0xff] }
 0x33d   :  { %2118 = vtanh.f32 %v1570_v45  ;;  %v1624_v47 = vpop.permute.xlu0 %1623  ;;  %v1592_v45 = vsub.f32 1.0, %v3474_v51 }
 0x33e   :  { %v1622_v49 = vpop.permute.xlu1 %1621  ;;  %v1669_v36 = vmul.f32 %v1624_v47, %v1589_v19 }
 0x341   :  { %v2113_v56 = vpop.eup %2112  ;;  %v1628_v37 = vpop.permute.xlu0 %1627 }
 0x342   :  { %v1626_v53 = vpop.permute.xlu1 %1625  ;;  %1723 = vrot.lane.b32.xlu0 %v2113_v56, %s2129_s4  ;;  %v1671_v12 = vmul.f32 %v1628_v37, %v1591_v54 }
 0x343   :  { %v1670_v28 = vmul.f32 %v1626_v53, %v1590_v29  ;;  %v1595_v29 = vsub.f32 1.0, %v2817_v44 }
 0x345   :  { %v2115_v0 = vpop.eup %2114  ;;  %v1632_v17 = vpop.permute.xlu0 %1631 }
 0x346   :  { %v2117_v40 = vpop.eup %2116  ;;  %v1630_v8 = vpop.permute.xlu1 %1629  ;;  %1727 = vrot.lane.b32.xlu0 %v2115_v0, %s2129_s4  ;;  %v1673_v6 = vmul.f32 %v1632_v17, %v1593_v41 }
 0x347   :  { %1725 = vrot.lane.b32.xlu1 %v2117_v40, %s2129_s4  ;;  %v1672_v56 = vmul.f32 %v1630_v8, %v1592_v45  ;;  %v1597_v40 = vsub.f32 1.0, %v2810_v1 }
 0x349   :  { %v3190_v21 = vpop.permute.xlu0 %1635 }
 0x34a   :  { %v2119_v60 = vpop.eup %2118  ;;  %v1634_v59 = vpop.permute.xlu1 %1633 }
 0x34b   :  { %1729 = vrot.lane.b32.xlu1 %v2119_v60, %s2129_s4  ;;  %v1674_v11 = vmul.f32 %v1634_v59, %v1594_v20  ;;  %v1598_v59 = vsub.f32 1.0, %v2812_v24 }
 0x34d   :  { %v1640_v30 = vpop.permute.xlu0 %1639 }
 0x34e   :  { %v3192_v3 = vpop.permute.xlu1 %1637  ;;  %v1677_v60 = vmul.f32 %v1640_v30, %v1597_v40 }
 0x351   :  { %v3194_v16 = vpop.permute.xlu0 %1643 }
 0x352   :  { %v1642_v50 = vpop.permute.xlu1 %1641 }
 0x355   :  { %v3198_v14 = vpop.permute.xlu0 %1647 }
 0x356   :  { %v3196_v42 = vpop.permute.xlu1 %1645 }
 0x35a   :  { %v3201_v52 = vpop.permute.xlu1 %1649 }
 0x363   :  { %v1704_v33 = vpop.permute.xlu0 %1703 }
 0x364   :  { %v1749_v34 = vmul.f32 %v2718_v18, %v1704_v33  ;;  %v1588_v18 = vsub.f32 1.0, %v3470_v39 }
 0x366   :  { %v1765_v5 = vadd.f32 %v1749_v34, %v1669_v36  ;;  %v1668_v35 = vmul.f32 %v1622_v49, %v1588_v18  ;;  %v1678_v36 = vmul.f32 %v1642_v50, %v1598_v59  ;;  %v3477_v18 = vld [vmem:[#allocation47_spill] sm:$0xff] }
 0x367   :  { %v1706_v26 = vpop.permute.xlu1 %1705 }
 0x368   :  { %v1750_v15 = vmul.f32 %v2722_v58, %v1706_v26  ;;  %1799 = vrot.lane.b32.xlu0 %v1765_v5, %s2127_s28  ;;  %v1675_v26 = vmul.f32 %v3190_v21, %v1595_v29 }
 0x36a   :  { %v1766_v63 = vadd.f32 %v1750_v15, %v1670_v28 }
 0x36c   :  { %1801 = vrot.lane.b32.xlu1 %v1766_v63, %s2127_s28 }
 0x36f   :  { %v1700_v13 = vpop.permute.xlu0 %1699 }
 0x370   :  { %v1747_v25 = vmul.f32 %v3469_v2, %v1700_v13  ;;  %v3475_v2 = vld [vmem:[#allocation46_spill] sm:$0xff] }
 0x371   :  { %v1599_v43 = vsub.f32 1.0, %v3475_v2 }
 0x372   :  { %v1763_v61 = vadd.f32 %v1747_v25, %v1667_v46  ;;  %v3476_v46 = vld [vmem:[#allocation48_spill] sm:$0xff] }
 0x373   :  { %v1679_v21 = vmul.f32 %v3194_v16, %v1599_v43  ;;  %v1601_v25 = vsub.f32 1.0, %v3476_v46 }
 0x374   :  { %v1702_v57 = vpop.permute.xlu1 %1701  ;;  %1795 = vrot.lane.b32.xlu0 %v1763_v61, %s2127_s28  ;;  %v1600_v61 = vsub.f32 1.0, %v3477_v18 }
 0x375   :  { %v1748_v62 = vmul.f32 %v3470_v39, %v1702_v57 }
 0x377   :  { %v1764_v58 = vadd.f32 %v1748_v62, %v1668_v35  ;;  %v1680_v62 = vmul.f32 %v3196_v42, %v1600_v61 }
 0x379   :  { %1797 = vrot.lane.b32.xlu1 %v1764_v58, %s2127_s28 }
 0x37b   :  { %v1712_v48 = vpop.permute.xlu0 %1711 }
 0x37c   :  { %v1753_v55 = vmul.f32 %v3471_v38, %v1712_v48  ;;  %v3478_v38 = vld [vmem:[#allocation49_spill] sm:$0xff] }
 0x37d   :  { %v1602_v41 = vsub.f32 1.0, %v3478_v38 }
 0x37e   :  { %v1769_v32 = vadd.f32 %v1753_v55, %v1673_v6 }
 0x37f   :  { %v1682_v55 = vmul.f32 %v3201_v52, %v1602_v41 }
 0x380   :  { %v1714_v10 = vpop.permute.xlu1 %1713  ;;  %1807 = vrot.lane.b32.xlu0 %v1769_v32, %s2127_s28 }
 0x381   :  { %v1754_v7 = vmul.f32 %v3472_v4, %v1714_v10 }
 0x383   :  { %v1770_v23 = vadd.f32 %v1754_v7, %v1674_v11 }
 0x385   :  { %1809 = vrot.lane.b32.xlu1 %v1770_v23, %s2127_s28 }
 0x387   :  { %v1708_v22 = vpop.permute.xlu0 %1707 }
 0x388   :  { %v1751_v31 = vmul.f32 %v3473_v9, %v1708_v22 }
 0x38a   :  { %v1767_v47 = vadd.f32 %v1751_v31, %v1671_v12 }
 0x38c   :  { %v1710_v49 = vpop.permute.xlu1 %1709  ;;  %1803 = vrot.lane.b32.xlu0 %v1767_v47, %s2127_s28 }
 0x38d   :  { %v1752_v53 = vmul.f32 %v3474_v51, %v1710_v49 }
 0x38f   :  { %v1768_v0 = vadd.f32 %v1752_v53, %v1672_v56 }
 0x391   :  { %1805 = vrot.lane.b32.xlu1 %v1768_v0, %s2127_s28 }
 0x394   :  { %v1720_v17 = vpop.permute.xlu0 %1719 }
 0x395   :  { %v1757_v37 = vmul.f32 %v2810_v1, %v1720_v17  ;;  %v1596_v1 = vsub.f32 1.0, %v2828_v27 }
 0x397   :  { %v1773_v19 = vadd.f32 %v1757_v37, %v1677_v60  ;;  %v1676_v50 = vmul.f32 %v3192_v3, %v1596_v1 }
 0x399   :  { %v1722_v33 = vpop.permute.xlu1 %1721  ;;  %1815 = vrot.lane.b32.xlu0 %v1773_v19, %s2127_s28 }
 0x39a   :  { %v1758_v8 = vmul.f32 %v2812_v24, %v1722_v33 }
 0x39c   :  { %v1774_v34 = vadd.f32 %v1758_v8, %v1678_v36 }
 0x39e   :  { %1817 = vrot.lane.b32.xlu1 %v1774_v34, %s2127_s28 }
 0x3a0   :  { %v1716_v5 = vpop.permute.xlu0 %1715 }
 0x3a1   :  { %v1755_v30 = vmul.f32 %v2817_v44, %v1716_v5 }
 0x3a3   :  { %v1771_v28 = vadd.f32 %v1755_v30, %v1675_v26 }
 0x3a5   :  { %v1718_v15 = vpop.permute.xlu1 %1717  ;;  %1811 = vrot.lane.b32.xlu0 %v1771_v28, %s2127_s28 }
 0x3a6   :  { %v1756_v24 = vmul.f32 %v2828_v27, %v1718_v15  ;;  %v1681_v27 = vmul.f32 %v3198_v14, %v1601_v25 }
 0x3a8   :  { %v1772_v63 = vadd.f32 %v1756_v24, %v1676_v50 }
 0x3aa   :  { %1813 = vrot.lane.b32.xlu1 %v1772_v63, %s2127_s28 }
 0x3b4   :  { %v1724_v13 = vpop.permute.xlu0 %1723 }
 0x3b5   :  { %v1759_v44 = vmul.f32 %v3475_v2, %v1724_v13 }
 0x3b7   :  { %v1775_v39 = vadd.f32 %v1759_v44, %v1679_v21 }
 0x3b8   :  { %v1728_v3 = vpop.permute.xlu0 %1727 }
 0x3b9   :  { %v1761_v57 = vmul.f32 %v3476_v46, %v1728_v3  ;;  %v1726_v35 = vpop.permute.xlu1 %1725  ;;  %1819 = vrot.lane.b32.xlu0 %v1775_v39, %s2127_s28 }
 0x3ba   :  { %v1760_v58 = vmul.f32 %v3477_v18, %v1726_v35 }
 0x3bb   :  { %v1777_v16 = vadd.f32 %v1761_v57, %v1681_v27 }
 0x3bc   :  { %v1776_v48 = vadd.f32 %v1760_v58, %v1680_v62 }
 0x3bd   :  { %v1730_v6 = vpop.permute.xlu1 %1729  ;;  %1823 = vrot.lane.b32.xlu0 %v1777_v16, %s2127_s28 }
 0x3be   :  { %v1762_v14 = vmul.f32 %v3478_v38, %v1730_v6  ;;  %1821 = vrot.lane.b32.xlu1 %v1776_v48, %s2127_s28 }
 0x3c0   :  { %v1778_v4 = vadd.f32 %v1762_v14, %v1682_v55 }
 0x3c2   :  { %1825 = vrot.lane.b32.xlu1 %v1778_v4, %s2127_s28 }
 0x3da   :  { %v1800_v20 = vpop.permute.xlu0 %1799 }
 0x3db   :  { %1845 = vst.msk [vmem:[%s3327_s7 + $0x10] sm:$0xff] %vm1109_vm2, %v1800_v20 }
 0x3de   :  { %v1802_v42 = vpop.permute.xlu1 %1801 }
 0x3df   :  { %1846 = vst.msk [vmem:[%s3327_s7 + $0x18] sm:$0xff] %vm1109_vm2, %v1802_v42 }
 0x3e6   :  { %v1796_v52 = vpop.permute.xlu0 %1795 }
 0x3e7   :  { %1843 = vst.msk [vmem:[%s3327_s7] sm:$0xff] %vm1109_vm2, %v1796_v52 }
 0x3eb   :  { %v1798_v32 = vpop.permute.xlu1 %1797 }
 0x3ec   :  { %1844 = vst.msk [vmem:[%s3327_s7 + $0x8] sm:$0xff] %vm1109_vm2, %v1798_v32 }
 0x3f2   :  { %v1808_v10 = vpop.permute.xlu0 %1807 }
 0x3f3   :  { %1849 = vst.msk [vmem:[%s3327_s7 + $0x30] sm:$0xff] %vm1109_vm2, %v1808_v10 }
 0x3f7   :  { %v1810_v11 = vpop.permute.xlu1 %1809 }
 0x3f8   :  { %1850 = vst.msk [vmem:[%s3327_s7 + $0x38] sm:$0xff] %vm1109_vm2, %v1810_v11 }
 0x3fe   :  { %v1804_v7 = vpop.permute.xlu0 %1803 }
 0x3ff   :  { %1847 = vst.msk [vmem:[%s3327_s7 + $0x20] sm:$0xff] %vm1109_vm2, %v1804_v7 }
 0x403   :  { %v1806_v23 = vpop.permute.xlu1 %1805 }
 0x404   :  { %1848 = vst.msk [vmem:[%s3327_s7 + $0x28] sm:$0xff] %vm1109_vm2, %v1806_v23 }
 0x40b   :  { %v1816_v9 = vpop.permute.xlu0 %1815 }
 0x40c   :  { %1853 = vst.msk [vmem:[%s3327_s7 + $0x50] sm:$0xff] %vm1109_vm2, %v1816_v9 }
 0x410   :  { %v1818_v54 = vpop.permute.xlu1 %1817 }
 0x411   :  { %1854 = vst.msk [vmem:[%s3327_s7 + $0x58] sm:$0xff] %vm1109_vm2, %v1818_v54 }
 0x417   :  { %v1812_v22 = vpop.permute.xlu0 %1811 }
 0x418   :  { %1851 = vst.msk [vmem:[%s3327_s7 + $0x40] sm:$0xff] %vm1109_vm2, %v1812_v22 }
 0x41c   :  { %v1814_v12 = vpop.permute.xlu1 %1813 }
 0x41d   :  { %1852 = vst.msk [vmem:[%s3327_s7 + $0x48] sm:$0xff] %vm1109_vm2, %v1814_v12 }
 0x42b   :  { %v1820_v31 = vpop.permute.xlu0 %1819 }
 0x42c   :  { %1855 = vst.msk [vmem:[%s3327_s7 + $0x60] sm:$0xff] %vm1109_vm2, %v1820_v31 }
 0x42f   :  { %v1824_v51 = vpop.permute.xlu0 %1823 }
 0x430   :  { %1857 = vst.msk [vmem:[%s3327_s7 + $0x70] sm:$0xff] %vm1109_vm2, %v1824_v51  ;;  %v1822_v45 = vpop.permute.xlu1 %1821 }
 0x431   :  { %1856 = vst.msk [vmem:[%s3327_s7 + $0x68] sm:$0xff] %vm1109_vm2, %v1822_v45 }
 0x434   :  { %v1826_v47 = vpop.permute.xlu1 %1825 }
 0x435   :  { %1858 = vst.msk [vmem:[%s3327_s7 + $0x78] sm:$0xff] %vm1109_vm2, %v1826_v47 }

</bundles_post_ra>
